<compile_context>
chip_gen: v7x
topology: tpu7x:2x2x1
jax: 0.10.0
libtpu: 0.0.40
codegen_flags: <defaults>
</compile_context>

<pallas_src>
import jax
import jax.numpy as jnp
from jax.experimental import pallas as pl
from jax.experimental.pallas import tpu as pltpu

_BN_EPS = 1e-5


def _round_up(v, m):
    return ((v + m - 1) // m) * m


# ---------------------------------------------------------------------------
# Fused whole-network kernel
# ---------------------------------------------------------------------------

def _make_gin_kernel(num_layers, num_row_tiles, tm):
    def kernel(eps_ref,            # SMEM (L,)            f32  per-layer GIN eps
               x_hbm,              # ANY  (N_pad, DP)     bf16 padded input features (HBM)
               a_ref,              # VMEM (TM, N_pad)     int8 adjacency row panel
               p_ref,              # VMEM (G_pad, TM)     bf16 pooling column panel
               w1_ref, b1_ref,     # VMEM (1, DP, DP) bf16 / (1, 1, DP) f32
               w2_ref, b2_ref,     # VMEM (1, DP, DP) bf16 / (1, 1, DP) f32
               wl1_ref, bl1_ref,   # VMEM (DP, DP) bf16 / (1, DP) f32
               wl2_ref, bl2_ref,   # VMEM (DP, CP) bf16 / (1, CP) f32
               o_ref,              # VMEM (G_pad, CP)     f32
               h0_scr,             # VMEM (N_pad, DP)     bf16 activations (even-layer write)
               h1_scr,             # VMEM (N_pad, DP)     bf16 activations (odd-layer write / x)
               pooled_scr,         # VMEM (G_pad, DP)     f32  sum-readout accumulator
               x_sem):             # DMA semaphore for the one-time x copy
        layer = pl.program_id(0)
        row = pl.program_id(1)

        # One-time HBM -> VMEM copy of the padded input features into the
        # layer-0 read buffer (x is never held as a resident pipeline block).
        @pl.when(jnp.logical_and(layer == 0, row == 0))
        def _():
            cp = pltpu.make_async_copy(x_hbm, h1_scr, x_sem)
            cp.start()
            cp.wait()

        row_start = pl.multiple_of(row * tm, tm)

        # int8 adjacency panel widened to bf16 on the VPU (overlaps MXU/DMA);
        # multiplicities <= 127 are exact.
        a_bf = a_ref[...].astype(jnp.float32).astype(jnp.bfloat16)

        def step(h_read, h_write):
            # Neighbor-sum aggregation for this row panel: A[rows, :] @ h_prev.
            h_prev = h_read[...]                                  # (N_pad, DP) bf16
            agg = jnp.dot(a_bf, h_prev,
                          preferred_element_type=jnp.float32)     # (TM, DP) f32

            # (1 + eps_l) * x + agg   (eps is a scalar read from SMEM).
            x_tile = h_read[pl.ds(row_start, tm), :].astype(jnp.float32)
            z = (1.0 + eps_ref[layer]) * x_tile + agg

            # MLP: Linear -> BN(eval, folded) -> ReLU -> Linear -> BN -> ReLU.
            h1 = jnp.dot(z.astype(jnp.bfloat16), w1_ref[0],
                         preferred_element_type=jnp.float32) + b1_ref[0]
            h1 = jnp.maximum(h1, 0.0)
            h2 = jnp.dot(h1.astype(jnp.bfloat16), w2_ref[0],
                         preferred_element_type=jnp.float32) + b2_ref[0]
            h2 = jnp.maximum(h2, 0.0)

            h2_bf = h2.astype(jnp.bfloat16)
            h_write[pl.ds(row_start, tm), :] = h2_bf

            # Last layer: fused sum-readout pooling + classification head, so
            # the final [N, hidden] activation never touches HBM.
            @pl.when(layer == num_layers - 1)
            def _():
                @pl.when(row == 0)
                def _():
                    pooled_scr[...] = jnp.zeros_like(pooled_scr)

                pooled_scr[...] += jnp.dot(p_ref[...], h2_bf,
                                           preferred_element_type=jnp.float32)

                @pl.when(row == num_row_tiles - 1)
                def _():
                    hh = jnp.dot(pooled_scr[...].astype(jnp.bfloat16), wl1_ref[...],
                                 preferred_element_type=jnp.float32) + bl1_ref[...]
                    hh = jnp.maximum(hh, 0.0)
                    # TODO(synk): dropout (p=0.5) is the identity in inference
                    # mode; training-mode RNG masking intentionally not emitted.
                    o_ref[...] = jnp.dot(hh.astype(jnp.bfloat16), wl2_ref[...],
                                         preferred_element_type=jnp.float32) + bl2_ref[...]

        # Statically-sloted ping-pong: even layers read h1 / write h0,
        # odd layers read h0 / write h1 (x is staged into h1 before layer 0).
        @pl.when(layer % 2 == 0)
        def _():
            step(h1_scr, h0_scr)

        @pl.when(layer % 2 == 1)
        def _():
            step(h0_scr, h1_scr)

    return kernel


# ---------------------------------------------------------------------------
# Host-side wrapper: fold BN, pad to lane-dense shapes, stack per-layer params
# ---------------------------------------------------------------------------

def gin_forward_pallas(params, x, adj, pool_mat):
    convs = params["convs"]
    num_layers = len(convs)
    n, f = x.shape
    g = pool_mat.shape[0]
    hidden = convs[0]["w2"].shape[1]
    num_classes = params["w_lin2"].shape[1]

    # Generation-aware VMEM capacity (64 MiB on v7x, 128 MiB on v5e/v6e).
    try:
        vmem_cap = int(pltpu.get_tpu_info().vmem_capacity_bytes)
    except Exception:
        vmem_cap = 64 * 1024 * 1024

    # Lane-dense padded sizes.
    dp = _round_up(max(f, hidden), 128)          # feature / hidden dim
    cp = _round_up(num_classes, 128)             # class dim
    tm_cap = 512 if vmem_cap >= (100 << 20) else 256   # bigger row panels on v5e/v6e
    tm = min(tm_cap, _round_up(n, 128))          # adjacency row-panel height
    n_pad = _round_up(n, tm)
    num_row_tiles = n_pad // tm
    g_pad = _round_up(g, 8)

    f32, bf16 = jnp.float32, jnp.bfloat16

    def pad2(a, rows, cols):
        a = jnp.asarray(a, f32)
        return jnp.zeros((rows, cols), f32).at[:a.shape[0], :a.shape[1]].set(a)

    # Eval-mode BN (gamma=1, beta=0, running stats (0,1)) folded into Linear:
    # w' = w * s, b' = b * s with s = 1/sqrt(1 + eps_bn).
    bn_scale = 1.0 / jnp.sqrt(f32(1.0 + _BN_EPS))

    w1 = jnp.stack([pad2(p["w1"] * bn_scale, dp, dp) for p in convs]).astype(bf16)
    b1 = jnp.stack([pad2(p["b1"] * bn_scale, 1, dp) for p in convs])
    w2 = jnp.stack([pad2(p["w2"] * bn_scale, dp, dp) for p in convs]).astype(bf16)
    b2 = jnp.stack([pad2(p["b2"] * bn_scale, 1, dp) for p in convs])
    eps = jnp.stack([p["eps"].reshape(()) for p in convs]).astype(f32)

    x_p = pad2(x, n_pad, dp).astype(bf16)
    # int8 adjacency stream: edge multiplicities must fit in int8 (<=127);
    # typical graphs have multiplicity 1, so this is exact.
    adj_i8 = jnp.round(pad2(adj, n_pad, n_pad)).astype(jnp.int8)
    pool_p = pad2(pool_mat, g_pad, n_pad).astype(bf16)  # 0/1 entries: exact in bf16
    wl1 = pad2(params["w_lin1"], dp, dp).astype(bf16)
    bl1 = pad2(params["b_lin1"], 1, dp)
    wl2 = pad2(params["w_lin2"], dp, cp).astype(bf16)
    bl2 = pad2(params["b_lin2"], 1, cp)

    # Advisory cost estimate for the XLA scheduler.
    flops = (2 * num_layers * (n_pad * n_pad * dp + 2 * n_pad * dp * dp)
             + 2 * g_pad * n_pad * dp + 2 * g_pad * dp * (dp + cp))
    bytes_accessed = (num_layers * n_pad * n_pad * 1          # int8 A, every layer
                      + n_pad * dp * 2                        # x, once
                      + g_pad * n_pad * 2                     # pool, last layer only
                      + num_layers * 2 * (dp * dp * 2 + dp * 4)
                      + dp * (dp + cp) * 2 + (dp + cp) * 4 + g_pad * cp * 4)

    # Scoped-VMEM budget, derived from the actual per-generation capacity.
    vmem_est = (2 * n_pad * dp * 2                    # two activation buffers (bf16)
                + 2 * tm * n_pad * 1                  # double-buffered int8 A panels
                + 2 * g_pad * tm * 2                  # double-buffered pooling panels
                + 2 * 2 * (dp * dp * 2 + dp * 4)      # double-buffered layer weights
                + dp * (dp + cp) * 2 + (dp + cp) * 4  # head weights
                + g_pad * dp * 4 + g_pad * cp * 4)    # pooled acc + output block
    vmem_limit = int(min(vmem_cap - 12 * 1024 * 1024,
                         max(32 * 1024 * 1024, 2 * vmem_est)))

    kernel = _make_gin_kernel(num_layers, num_row_tiles, tm)
    last_layer = num_layers - 1

    out = pl.pallas_call(
        kernel,
        out_shape=jax.ShapeDtypeStruct((g_pad, cp), f32),
        grid=(num_layers, num_row_tiles),
        in_specs=[
            pl.BlockSpec(memory_space=pltpu.MemorySpace.SMEM),   # eps (per-layer scalars)
            pl.BlockSpec(memory_space=pl.ANY),                   # x stays in HBM (manual DMA)
            pl.BlockSpec((tm, n_pad), lambda l, i: (i, 0)),      # int8 adjacency row panel
            # Pooling panel DMA gated to the last layer only.
            pl.BlockSpec((g_pad, tm),
                         lambda l, i: (0, jnp.where(l == last_layer, i, 0))),
            pl.BlockSpec((1, dp, dp), lambda l, i: (l, 0, 0)),   # W1[l]
            pl.BlockSpec((1, 1, dp), lambda l, i: (l, 0, 0)),    # B1[l]
            pl.BlockSpec((1, dp, dp), lambda l, i: (l, 0, 0)),   # W2[l]
            pl.BlockSpec((1, 1, dp), lambda l, i: (l, 0, 0)),    # B2[l]
            pl.BlockSpec((dp, dp), lambda l, i: (0, 0)),         # w_lin1
            pl.BlockSpec((1, dp), lambda l, i: (0, 0)),          # b_lin1
            pl.BlockSpec((dp, cp), lambda l, i: (0, 0)),         # w_lin2
            pl.BlockSpec((1, cp), lambda l, i: (0, 0)),          # b_lin2
        ],
        out_specs=pl.BlockSpec((g_pad, cp), lambda l, i: (0, 0)),
        scratch_shapes=[
            pltpu.VMEM((n_pad, dp), bf16),       # activations (even-layer write)
            pltpu.VMEM((n_pad, dp), bf16),       # activations (odd-layer write / staged x)
            pltpu.VMEM((g_pad, dp), f32),        # sum-readout accumulator
            pltpu.SemaphoreType.DMA,             # one-time x copy
        ],
        compiler_params=pltpu.CompilerParams(
            dimension_semantics=("arbitrary", "arbitrary"),
            vmem_limit_bytes=vmem_limit,
        ),
        cost_estimate=pl.CostEstimate(
            flops=int(flops), transcendentals=0,
            bytes_accessed=int(bytes_accessed)),
    )(eps, x_p, adj_i8, pool_p, w1, b1, w2, b2, wl1, bl1, wl2, bl2)

    return out[:g, :num_classes]


# ---------------------------------------------------------------------------
# Parameter init (deterministic, mirrors the PyTorch module's shapes)
# ---------------------------------------------------------------------------

def _linear_init(key, fan_in, fan_out):
    kw, kb = jax.random.split(key)
    bound = 1.0 / jnp.sqrt(jnp.float32(fan_in))
    w = jax.random.uniform(kw, (fan_in, fan_out), jnp.float32, -bound, bound)
    b = jax.random.uniform(kb, (1, fan_out), jnp.float32, -bound, bound)
    return w, b


def _gin_conv_params(key, in_dim, hidden):
    k1, k2 = jax.random.split(key)
    w1, b1 = _linear_init(k1, in_dim, hidden)
    w2, b2 = _linear_init(k2, hidden, hidden)
    eps = jnp.zeros((1, 1), jnp.float32)   # train_eps=True, initial value 0
    return dict(w1=w1, b1=b1, w2=w2, b2=b2, eps=eps)


def init_gin(key, num_features, num_layers, hidden, num_classes):
    keys = jax.random.split(key, num_layers + 2)
    convs = [_gin_conv_params(keys[0], num_features, hidden)]
    for i in range(num_layers - 1):
        convs.append(_gin_conv_params(keys[1 + i], hidden, hidden))
    w_lin1, b_lin1 = _linear_init(keys[num_layers], hidden, hidden)
    w_lin2, b_lin2 = _linear_init(keys[num_layers + 1], hidden, num_classes)
    return dict(convs=convs, w_lin1=w_lin1, b_lin1=b_lin1,
                w_lin2=w_lin2, b_lin2=b_lin2)


# ---------------------------------------------------------------------------
# Pure-JAX f32 reference (unfused, unfolded BN) for correctness checking
# ---------------------------------------------------------------------------

def gin_forward_ref(params, x, adj, pool_mat):
    def bn(v):  # eval-mode BN: gamma=1, beta=0, running_mean=0, running_var=1
        return v / jnp.sqrt(1.0 + _BN_EPS)

    h = x
    for p in params["convs"]:
        z = (1.0 + p["eps"][0, 0]) * h + adj @ h
        h = jnp.maximum(bn(z @ p["w1"] + p["b1"]), 0.0)
        h = jnp.maximum(bn(h @ p["w2"] + p["b2"]), 0.0)
    pooled = pool_mat @ h
    h = jnp.maximum(pooled @ params["w_lin1"] + params["b_lin1"], 0.0)
    return h @ params["w_lin2"] + params["b_lin2"]


# ---------------------------------------------------------------------------
# Example run
# ---------------------------------------------------------------------------

if __name__ == "__main__":
    num_features, num_layers, hidden, num_classes = 8, 3, 32, 4
    num_nodes, num_graphs, nodes_per_graph = 16, 2, 8
    edges_per_graph = 16

    key = jax.random.PRNGKey(0)
    k_param, k_x, k_src, k_dst = jax.random.split(key, 4)

    params = init_gin(k_param, num_features, num_layers, hidden, num_classes)

    # Node features [N, F]
    x = jax.random.normal(k_x, (num_nodes, num_features), jnp.float32)

    # Batch assignment: first 8 nodes -> graph 0, next 8 -> graph 1
    batch = jnp.repeat(jnp.arange(num_graphs, dtype=jnp.int32), nodes_per_graph)

    # Random intra-graph edges; messages flow src -> dst.
    src0 = jax.random.randint(k_src, (edges_per_graph,), 0, nodes_per_graph)
    dst0 = jax.random.randint(k_dst, (edges_per_graph,), 0, nodes_per_graph)
    src = jnp.concatenate([src0, src0 + nodes_per_graph])
    dst = jnp.concatenate([dst0, dst0 + nodes_per_graph])

    # Dense adjacency: A[dst, src] += 1  (agg[i] = sum_{j->i} x[j])
    adj = jnp.zeros((num_nodes, num_nodes), jnp.float32).at[dst, src].add(1.0)
    # Edge multiplicities must fit in int8 (adjacency is streamed as int8).
    assert float(adj.max()) <= 127.0

    # Sum-readout pooling matrix [G, N]
    pool_mat = (batch[None, :] == jnp.arange(num_graphs)[:, None]).astype(jnp.float32)

    out = gin_forward_pallas(params, x, adj, pool_mat)
    out = jax.block_until_ready(out)

    ref = gin_forward_ref(params, x, adj, pool_mat)
    assert out.shape == (num_graphs, num_classes)
    # bf16 MXU inputs / bf16 inter-layer activations (f32 accumulation) ->
    # slightly looser tolerance than pure f32.
    assert jnp.allclose(out, ref, atol=3e-2, rtol=3e-2), (out, ref)

    print("KERNEL_OK")
</pallas_src>

<mosaic_0001>
module attributes {stable_mosaic.version = 11 : i64} {
  func.func @kernel(%arg0: i32, %arg1: i32, %arg2: memref<3xf32, #tpu.memory_space<smem>>, %arg3: memref<128x128xbf16, #tpu.memory_space<any>>, %arg4: memref<128x128xi8, #tpu.memory_space<vmem>>, %arg5: memref<8x128xbf16, #tpu.memory_space<vmem>>, %arg6: memref<1x128x128xbf16, #tpu.memory_space<vmem>>, %arg7: memref<1x1x128xf32, #tpu.memory_space<vmem>>, %arg8: memref<1x128x128xbf16, #tpu.memory_space<vmem>>, %arg9: memref<1x1x128xf32, #tpu.memory_space<vmem>>, %arg10: memref<128x128xbf16, #tpu.memory_space<vmem>>, %arg11: memref<1x128xf32, #tpu.memory_space<vmem>>, %arg12: memref<128x128xbf16, #tpu.memory_space<vmem>>, %arg13: memref<1x128xf32, #tpu.memory_space<vmem>>, %arg14: memref<8x128xf32, #tpu.memory_space<vmem>>, %arg15: memref<128x128xbf16, #tpu.memory_space<vmem>>, %arg16: memref<128x128xbf16, #tpu.memory_space<vmem>>, %arg17: memref<8x128xf32, #tpu.memory_space<vmem>>, %arg18: memref<!tpu.dma_semaphore, #tpu.memory_space<semaphore_mem>>) attributes {dimension_semantics = [#tpu.dimension_semantics<arbitrary>, #tpu.dimension_semantics<arbitrary>], iteration_bounds = array<i64: 3, 1>, scalar_prefetch = 0 : i64, scratch_operands = 4 : i64, tpu.core_type = #tpu.core_type<tc>, window_params = [{transform_indices = @transform_0, window_bounds = array<i64: 3>}, {}, {transform_indices = @transform_2, window_bounds = array<i64: 128, 128>}, {transform_indices = @transform_3, window_bounds = array<i64: 8, 128>}, {transform_indices = @transform_4, window_bounds = array<i64: 1, 128, 128>}, {transform_indices = @transform_5, window_bounds = array<i64: 1, 1, 128>}, {transform_indices = @transform_6, window_bounds = array<i64: 1, 128, 128>}, {transform_indices = @transform_7, window_bounds = array<i64: 1, 1, 128>}, {pipeline_mode = #tpu.pipeline_mode<synchronous>, transform_indices = @transform_8, window_bounds = array<i64: 128, 128>}, {pipeline_mode = #tpu.pipeline_mode<synchronous>, transform_indices = @transform_9, window_bounds = array<i64: 1, 128>}, {pipeline_mode = #tpu.pipeline_mode<synchronous>, transform_indices = @transform_10, window_bounds = array<i64: 128, 128>}, {pipeline_mode = #tpu.pipeline_mode<synchronous>, transform_indices = @transform_11, window_bounds = array<i64: 1, 128>}, {pipeline_mode = #tpu.pipeline_mode<synchronous>, transform_indices = @transform_12, window_bounds = array<i64: 8, 128>}]} {
    %c0_i32 = arith.constant 0 : i32
    %0 = arith.cmpi eq, %arg0, %c0_i32 : i32
    %c0_i32_0 = arith.constant 0 : i32
    %1 = arith.cmpi eq, %arg1, %c0_i32_0 : i32
    %2 = arith.andi %0, %1 : i1
    %3 = arith.extui %2 : i1 to i32
    %c0_i32_1 = arith.constant 0 : i32
    %4 = arith.cmpi ne, %3, %c0_i32_1 : i32
    scf.if %4 {
      tpu.enqueue_dma source(%arg3 : memref<128x128xbf16, #tpu.memory_space<any>>) target(%arg16 : memref<128x128xbf16, #tpu.memory_space<vmem>>) target_semaphore(%arg18 : memref<!tpu.dma_semaphore, #tpu.memory_space<semaphore_mem>>)
      tpu.wait_dma2 semaphore(%arg18 : memref<!tpu.dma_semaphore, #tpu.memory_space<semaphore_mem>>) src(%arg3 : memref<128x128xbf16, #tpu.memory_space<any>>) dst(%arg16 : memref<128x128xbf16, #tpu.memory_space<vmem>>)
    } else {
    }
    %c128_i32 = arith.constant 128 : i32
    %5 = arith.muli %arg1, %c128_i32 : i32
    %6 = tpu.assume_multiple %5, 128 : i32
    %c0 = arith.constant 0 : index
    %c0_2 = arith.constant 0 : index
    %7 = vector.load %arg4[%c0, %c0_2] : memref<128x128xi8, #tpu.memory_space<vmem>>, vector<128x128xi8>
    %8 = arith.sitofp %7 : vector<128x128xi8> to vector<128x128xf32>
    %9 = arith.truncf %8 : vector<128x128xf32> to vector<128x128xbf16>
    %c2_i32 = arith.constant 2 : i32
    %c0_i32_3 = arith.constant 0 : i32
    %10 = arith.cmpi eq, %c2_i32, %c0_i32_3 : i32
    %c1_i32 = arith.constant 1 : i32
    %11 = arith.select %10, %c1_i32, %c2_i32 : i32
    %12 = arith.remsi %arg0, %11 : i32
    %c0_i32_4 = arith.constant 0 : i32
    %13 = arith.cmpi ne, %12, %c0_i32_4 : i32
    %c0_i32_5 = arith.constant 0 : i32
    %14 = arith.cmpi slt, %12, %c0_i32_5 : i32
    %c0_i32_6 = arith.constant 0 : i32
    %15 = arith.cmpi slt, %11, %c0_i32_6 : i32
    %16 = arith.xori %14, %15 : i1
    %17 = arith.andi %16, %13 : i1
    %18 = arith.addi %12, %11 : i32
    %19 = arith.select %17, %18, %12 : i32
    %c0_i32_7 = arith.constant 0 : i32
    %20 = arith.cmpi eq, %19, %c0_i32_7 : i32
    %21 = arith.extui %20 : i1 to i32
    %c0_i32_8 = arith.constant 0 : i32
    %22 = arith.cmpi ne, %21, %c0_i32_8 : i32
    scf.if %22 {
      %c0_17 = arith.constant 0 : index
      %c0_18 = arith.constant 0 : index
      %36 = vector.load %arg16[%c0_17, %c0_18] : memref<128x128xbf16, #tpu.memory_space<vmem>>, vector<128x128xbf16>
      %cst = arith.constant dense<0.000000e+00> : vector<128x128xf32>
      %37 = tpu.matmul %9, %36, %cst {dimension_numbers = #tpu.dot_dimension_numbers<[1], [0], [0], [1], [0, 0, 1, 1], [], []>} : vector<128x128xbf16>, vector<128x128xbf16>, vector<128x128xf32> -> vector<128x128xf32>
      %38 = arith.index_cast %6 : i32 to index
      %c0_19 = arith.constant 0 : index
      %39 = vector.load %arg16[%38, %c0_19] : memref<128x128xbf16, #tpu.memory_space<vmem>>, vector<128x128xbf16>
      %40 = arith.extf %39 : vector<128x128xbf16> to vector<128x128xf32>
      %41 = arith.index_cast %arg0 : i32 to index
      %42 = memref.load %arg2[%41] : memref<3xf32, #tpu.memory_space<smem>>
      %cst_20 = arith.constant 1.000000e+00 : f32
      %43 = arith.addf %cst_20, %42 : f32
      %44 = vector.broadcast %43 : f32 to vector<128x128xf32>
      %45 = arith.mulf %44, %40 : vector<128x128xf32>
      %46 = arith.addf %45, %37 : vector<128x128xf32>
      %47 = arith.truncf %46 : vector<128x128xf32> to vector<128x128xbf16>
      %c0_21 = arith.constant 0 : index
      %c0_22 = arith.constant 0 : index
      %c0_23 = arith.constant 0 : index
      %48 = vector.load %arg6[%c0_21, %c0_22, %c0_23] : memref<1x128x128xbf16, #tpu.memory_space<vmem>>, vector<1x128x128xbf16>
      %49 = vector.shape_cast %48 : vector<1x128x128xbf16> to vector<128x128xbf16>
      %cst_24 = arith.constant dense<0.000000e+00> : vector<128x128xf32>
      %50 = tpu.matmul %47, %49, %cst_24 {dimension_numbers = #tpu.dot_dimension_numbers<[1], [0], [0], [1], [0, 0, 1, 1], [], []>} : vector<128x128xbf16>, vector<128x128xbf16>, vector<128x128xf32> -> vector<128x128xf32>
      %c0_25 = arith.constant 0 : index
      %c0_26 = arith.constant 0 : index
      %c0_27 = arith.constant 0 : index
      %51 = vector.load %arg7[%c0_25, %c0_26, %c0_27] : memref<1x1x128xf32, #tpu.memory_space<vmem>>, vector<1x1x128xf32>
      %52 = vector.shape_cast %51 : vector<1x1x128xf32> to vector<1x128xf32>
      %53 = vector.broadcast %52 : vector<1x128xf32> to vector<128x128xf32>
      %54 = arith.addf %50, %53 : vector<128x128xf32>
      %cst_28 = arith.constant 0.000000e+00 : f32
      %55 = vector.broadcast %cst_28 : f32 to vector<128x128xf32>
      %56 = arith.maximumf %54, %55 : vector<128x128xf32>
      %57 = arith.truncf %56 : vector<128x128xf32> to vector<128x128xbf16>
      %c0_29 = arith.constant 0 : index
      %c0_30 = arith.constant 0 : index
      %c0_31 = arith.constant 0 : index
      %58 = vector.load %arg8[%c0_29, %c0_30, %c0_31] : memref<1x128x128xbf16, #tpu.memory_space<vmem>>, vector<1x128x128xbf16>
      %59 = vector.shape_cast %58 : vector<1x128x128xbf16> to vector<128x128xbf16>
      %cst_32 = arith.constant dense<0.000000e+00> : vector<128x128xf32>
      %60 = tpu.matmul %57, %59, %cst_32 {dimension_numbers = #tpu.dot_dimension_numbers<[1], [0], [0], [1], [0, 0, 1, 1], [], []>} : vector<128x128xbf16>, vector<128x128xbf16>, vector<128x128xf32> -> vector<128x128xf32>
      %c0_33 = arith.constant 0 : index
      %c0_34 = arith.constant 0 : index
      %c0_35 = arith.constant 0 : index
      %61 = vector.load %arg9[%c0_33, %c0_34, %c0_35] : memref<1x1x128xf32, #tpu.memory_space<vmem>>, vector<1x1x128xf32>
      %62 = vector.shape_cast %61 : vector<1x1x128xf32> to vector<1x128xf32>
      %63 = vector.broadcast %62 : vector<1x128xf32> to vector<128x128xf32>
      %64 = arith.addf %60, %63 : vector<128x128xf32>
      %cst_36 = arith.constant 0.000000e+00 : f32
      %65 = vector.broadcast %cst_36 : f32 to vector<128x128xf32>
      %66 = arith.maximumf %64, %65 : vector<128x128xf32>
      %67 = arith.truncf %66 : vector<128x128xf32> to vector<128x128xbf16>
      %68 = arith.index_cast %6 : i32 to index
      %c0_37 = arith.constant 0 : index
      %69 = vector.load %arg15[%68, %c0_37] : memref<128x128xbf16, #tpu.memory_space<vmem>>, vector<128x128xbf16>
      tpu.vector_store %arg15[%68, %c0_37], %67 {strides = array<i32>} : memref<128x128xbf16, #tpu.memory_space<vmem>>, vector<128x128xbf16>,
      %c2_i32_38 = arith.constant 2 : i32
      %70 = arith.cmpi eq, %arg0, %c2_i32_38 : i32
      %71 = arith.extui %70 : i1 to i32
      %c0_i32_39 = arith.constant 0 : i32
      %72 = arith.cmpi ne, %71, %c0_i32_39 : i32
      scf.if %72 {
        %c0_i32_40 = arith.constant 0 : i32
        %73 = arith.cmpi eq, %arg1, %c0_i32_40 : i32
        %74 = arith.extui %73 : i1 to i32
        %c0_i32_41 = arith.constant 0 : i32
        %75 = arith.cmpi ne, %74, %c0_i32_41 : i32
        scf.if %75 {
          %cst_51 = arith.constant 0.000000e+00 : f32
          %84 = vector.broadcast %cst_51 : f32 to vector<8x128xf32>
          %c0_52 = arith.constant 0 : index
          %c0_53 = arith.constant 0 : index
          %85 = vector.load %arg17[%c0_52, %c0_53] : memref<8x128xf32, #tpu.memory_space<vmem>>, vector<8x128xf32>
          tpu.vector_store %arg17[%c0_52, %c0_53], %84 {strides = array<i32>} : memref<8x128xf32, #tpu.memory_space<vmem>>, vector<8x128xf32>,
        } else {
        }
        %c0_42 = arith.constant 0 : index
        %c0_43 = arith.constant 0 : index
        %76 = vector.load %arg17[%c0_42, %c0_43] : memref<8x128xf32, #tpu.memory_space<vmem>>, vector<8x128xf32>
        %c0_44 = arith.constant 0 : index
        %c0_45 = arith.constant 0 : index
        %77 = vector.load %arg5[%c0_44, %c0_45] : memref<8x128xbf16, #tpu.memory_space<vmem>>, vector<8x128xbf16>
        %cst_46 = arith.constant dense<0.000000e+00> : vector<8x128xf32>
        %78 = tpu.matmul %77, %67, %cst_46 {dimension_numbers = #tpu.dot_dimension_numbers<[1], [0], [0], [1], [0, 0, 1, 1], [], []>} : vector<8x128xbf16>, vector<128x128xbf16>, vector<8x128xf32> -> vector<8x128xf32>
        %79 = arith.addf %76, %78 : vector<8x128xf32>
        %c0_47 = arith.constant 0 : index
        %c0_48 = arith.constant 0 : index
        %80 = vector.load %arg17[%c0_47, %c0_48] : memref<8x128xf32, #tpu.memory_space<vmem>>, vector<8x128xf32>
        tpu.vector_store %arg17[%c0_47, %c0_48], %79 {strides = array<i32>} : memref<8x128xf32, #tpu.memory_space<vmem>>, vector<8x128xf32>,
        %c0_i32_49 = arith.constant 0 : i32
        %81 = arith.cmpi eq, %arg1, %c0_i32_49 : i32
        %82 = arith.extui %81 : i1 to i32
        %c0_i32_50 = arith.constant 0 : i32
        %83 = arith.cmpi ne, %82, %c0_i32_50 : i32
        scf.if %83 {
          %c0_51 = arith.constant 0 : index
          %c0_52 = arith.constant 0 : index
          %84 = vector.load %arg17[%c0_51, %c0_52] : memref<8x128xf32, #tpu.memory_space<vmem>>, vector<8x128xf32>
          %85 = arith.truncf %84 : vector<8x128xf32> to vector<8x128xbf16>
          %c0_53 = arith.constant 0 : index
          %c0_54 = arith.constant 0 : index
          %86 = vector.load %arg10[%c0_53, %c0_54] : memref<128x128xbf16, #tpu.memory_space<vmem>>, vector<128x128xbf16>
          %cst_55 = arith.constant dense<0.000000e+00> : vector<8x128xf32>
          %87 = tpu.matmul %85, %86, %cst_55 {dimension_numbers = #tpu.dot_dimension_numbers<[1], [0], [0], [1], [0, 0, 1, 1], [], []>} : vector<8x128xbf16>, vector<128x128xbf16>, vector<8x128xf32> -> vector<8x128xf32>
          %c0_56 = arith.constant 0 : index
          %c0_57 = arith.constant 0 : index
          %88 = vector.load %arg11[%c0_56, %c0_57] : memref<1x128xf32, #tpu.memory_space<vmem>>, vector<1x128xf32>
          %89 = vector.broadcast %88 : vector<1x128xf32> to vector<8x128xf32>
          %90 = arith.addf %87, %89 : vector<8x128xf32>
          %cst_58 = arith.constant 0.000000e+00 : f32
          %91 = vector.broadcast %cst_58 : f32 to vector<8x128xf32>
          %92 = arith.maximumf %90, %91 : vector<8x128xf32>
          %93 = arith.truncf %92 : vector<8x128xf32> to vector<8x128xbf16>
          %c0_59 = arith.constant 0 : index
          %c0_60 = arith.constant 0 : index
          %94 = vector.load %arg12[%c0_59, %c0_60] : memref<128x128xbf16, #tpu.memory_space<vmem>>, vector<128x128xbf16>
          %cst_61 = arith.constant dense<0.000000e+00> : vector<8x128xf32>
          %95 = tpu.matmul %93, %94, %cst_61 {dimension_numbers = #tpu.dot_dimension_numbers<[1], [0], [0], [1], [0, 0, 1, 1], [], []>} : vector<8x128xbf16>, vector<128x128xbf16>, vector<8x128xf32> -> vector<8x128xf32>
          %c0_62 = arith.constant 0 : index
          %c0_63 = arith.constant 0 : index
          %96 = vector.load %arg13[%c0_62, %c0_63] : memref<1x128xf32, #tpu.memory_space<vmem>>, vector<1x128xf32>
          %97 = vector.broadcast %96 : vector<1x128xf32> to vector<8x128xf32>
          %98 = arith.addf %95, %97 : vector<8x128xf32>
          %c0_64 = arith.constant 0 : index
          %c0_65 = arith.constant 0 : index
          %99 = vector.load %arg14[%c0_64, %c0_65] : memref<8x128xf32, #tpu.memory_space<vmem>>, vector<8x128xf32>
          tpu.vector_store %arg14[%c0_64, %c0_65], %98 {strides = array<i32>} : memref<8x128xf32, #tpu.memory_space<vmem>>, vector<8x128xf32>,
        } else {
        }
      } else {
      }
    } else {
    }
    %c2_i32_9 = arith.constant 2 : i32
    %c0_i32_10 = arith.constant 0 : i32
    %23 = arith.cmpi eq, %c2_i32_9, %c0_i32_10 : i32
    %c1_i32_11 = arith.constant 1 : i32
    %24 = arith.select %23, %c1_i32_11, %c2_i32_9 : i32
    %25 = arith.remsi %arg0, %24 : i32
    %c0_i32_12 = arith.constant 0 : i32
    %26 = arith.cmpi ne, %25, %c0_i32_12 : i32
    %c0_i32_13 = arith.constant 0 : i32
    %27 = arith.cmpi slt, %25, %c0_i32_13 : i32
    %c0_i32_14 = arith.constant 0 : i32
    %28 = arith.cmpi slt, %24, %c0_i32_14 : i32
    %29 = arith.xori %27, %28 : i1
    %30 = arith.andi %29, %26 : i1
    %31 = arith.addi %25, %24 : i32
    %32 = arith.select %30, %31, %25 : i32
    %c1_i32_15 = arith.constant 1 : i32
    %33 = arith.cmpi eq, %32, %c1_i32_15 : i32
    %34 = arith.extui %33 : i1 to i32
    %c0_i32_16 = arith.constant 0 : i32
    %35 = arith.cmpi ne, %34, %c0_i32_16 : i32
    scf.if %35 {
      %c0_17 = arith.constant 0 : index
      %c0_18 = arith.constant 0 : index
      %36 = vector.load %arg15[%c0_17, %c0_18] : memref<128x128xbf16, #tpu.memory_space<vmem>>, vector<128x128xbf16>
      %cst = arith.constant dense<0.000000e+00> : vector<128x128xf32>
      %37 = tpu.matmul %9, %36, %cst {dimension_numbers = #tpu.dot_dimension_numbers<[1], [0], [0], [1], [0, 0, 1, 1], [], []>} : vector<128x128xbf16>, vector<128x128xbf16>, vector<128x128xf32> -> vector<128x128xf32>
      %38 = arith.index_cast %6 : i32 to index
      %c0_19 = arith.constant 0 : index
      %39 = vector.load %arg15[%38, %c0_19] : memref<128x128xbf16, #tpu.memory_space<vmem>>, vector<128x128xbf16>
      %40 = arith.extf %39 : vector<128x128xbf16> to vector<128x128xf32>
      %41 = arith.index_cast %arg0 : i32 to index
      %42 = memref.load %arg2[%41] : memref<3xf32, #tpu.memory_space<smem>>
      %cst_20 = arith.constant 1.000000e+00 : f32
      %43 = arith.addf %cst_20, %42 : f32
      %44 = vector.broadcast %43 : f32 to vector<128x128xf32>
      %45 = arith.mulf %44, %40 : vector<128x128xf32>
      %46 = arith.addf %45, %37 : vector<128x128xf32>
      %47 = arith.truncf %46 : vector<128x128xf32> to vector<128x128xbf16>
      %c0_21 = arith.constant 0 : index
      %c0_22 = arith.constant 0 : index
      %c0_23 = arith.constant 0 : index
      %48 = vector.load %arg6[%c0_21, %c0_22, %c0_23] : memref<1x128x128xbf16, #tpu.memory_space<vmem>>, vector<1x128x128xbf16>
      %49 = vector.shape_cast %48 : vector<1x128x128xbf16> to vector<128x128xbf16>
      %cst_24 = arith.constant dense<0.000000e+00> : vector<128x128xf32>
      %50 = tpu.matmul %47, %49, %cst_24 {dimension_numbers = #tpu.dot_dimension_numbers<[1], [0], [0], [1], [0, 0, 1, 1], [], []>} : vector<128x128xbf16>, vector<128x128xbf16>, vector<128x128xf32> -> vector<128x128xf32>
      %c0_25 = arith.constant 0 : index
      %c0_26 = arith.constant 0 : index
      %c0_27 = arith.constant 0 : index
      %51 = vector.load %arg7[%c0_25, %c0_26, %c0_27] : memref<1x1x128xf32, #tpu.memory_space<vmem>>, vector<1x1x128xf32>
      %52 = vector.shape_cast %51 : vector<1x1x128xf32> to vector<1x128xf32>
      %53 = vector.broadcast %52 : vector<1x128xf32> to vector<128x128xf32>
      %54 = arith.addf %50, %53 : vector<128x128xf32>
      %cst_28 = arith.constant 0.000000e+00 : f32
      %55 = vector.broadcast %cst_28 : f32 to vector<128x128xf32>
      %56 = arith.maximumf %54, %55 : vector<128x128xf32>
      %57 = arith.truncf %56 : vector<128x128xf32> to vector<128x128xbf16>
      %c0_29 = arith.constant 0 : index
      %c0_30 = arith.constant 0 : index
      %c0_31 = arith.constant 0 : index
      %58 = vector.load %arg8[%c0_29, %c0_30, %c0_31] : memref<1x128x128xbf16, #tpu.memory_space<vmem>>, vector<1x128x128xbf16>
      %59 = vector.shape_cast %58 : vector<1x128x128xbf16> to vector<128x128xbf16>
      %cst_32 = arith.constant dense<0.000000e+00> : vector<128x128xf32>
      %60 = tpu.matmul %57, %59, %cst_32 {dimension_numbers = #tpu.dot_dimension_numbers<[1], [0], [0], [1], [0, 0, 1, 1], [], []>} : vector<128x128xbf16>, vector<128x128xbf16>, vector<128x128xf32> -> vector<128x128xf32>
      %c0_33 = arith.constant 0 : index
      %c0_34 = arith.constant 0 : index
      %c0_35 = arith.constant 0 : index
      %61 = vector.load %arg9[%c0_33, %c0_34, %c0_35] : memref<1x1x128xf32, #tpu.memory_space<vmem>>, vector<1x1x128xf32>
      %62 = vector.shape_cast %61 : vector<1x1x128xf32> to vector<1x128xf32>
      %63 = vector.broadcast %62 : vector<1x128xf32> to vector<128x128xf32>
      %64 = arith.addf %60, %63 : vector<128x128xf32>
      %cst_36 = arith.constant 0.000000e+00 : f32
      %65 = vector.broadcast %cst_36 : f32 to vector<128x128xf32>
      %66 = arith.maximumf %64, %65 : vector<128x128xf32>
      %67 = arith.truncf %66 : vector<128x128xf32> to vector<128x128xbf16>
      %68 = arith.index_cast %6 : i32 to index
      %c0_37 = arith.constant 0 : index
      %69 = vector.load %arg16[%68, %c0_37] : memref<128x128xbf16, #tpu.memory_space<vmem>>, vector<128x128xbf16>
      tpu.vector_store %arg16[%68, %c0_37], %67 {strides = array<i32>} : memref<128x128xbf16, #tpu.memory_space<vmem>>, vector<128x128xbf16>,
      %c2_i32_38 = arith.constant 2 : i32
      %70 = arith.cmpi eq, %arg0, %c2_i32_38 : i32
      %71 = arith.extui %70 : i1 to i32
      %c0_i32_39 = arith.constant 0 : i32
      %72 = arith.cmpi ne, %71, %c0_i32_39 : i32
      scf.if %72 {
        %c0_i32_40 = arith.constant 0 : i32
        %73 = arith.cmpi eq, %arg1, %c0_i32_40 : i32
        %74 = arith.extui %73 : i1 to i32
        %c0_i32_41 = arith.constant 0 : i32
        %75 = arith.cmpi ne, %74, %c0_i32_41 : i32
        scf.if %75 {
          %cst_51 = arith.constant 0.000000e+00 : f32
          %84 = vector.broadcast %cst_51 : f32 to vector<8x128xf32>
          %c0_52 = arith.constant 0 : index
          %c0_53 = arith.constant 0 : index
          %85 = vector.load %arg17[%c0_52, %c0_53] : memref<8x128xf32, #tpu.memory_space<vmem>>, vector<8x128xf32>
          tpu.vector_store %arg17[%c0_52, %c0_53], %84 {strides = array<i32>} : memref<8x128xf32, #tpu.memory_space<vmem>>, vector<8x128xf32>,
        } else {
        }
        %c0_42 = arith.constant 0 : index
        %c0_43 = arith.constant 0 : index
        %76 = vector.load %arg17[%c0_42, %c0_43] : memref<8x128xf32, #tpu.memory_space<vmem>>, vector<8x128xf32>
        %c0_44 = arith.constant 0 : index
        %c0_45 = arith.constant 0 : index
        %77 = vector.load %arg5[%c0_44, %c0_45] : memref<8x128xbf16, #tpu.memory_space<vmem>>, vector<8x128xbf16>
        %cst_46 = arith.constant dense<0.000000e+00> : vector<8x128xf32>
        %78 = tpu.matmul %77, %67, %cst_46 {dimension_numbers = #tpu.dot_dimension_numbers<[1], [0], [0], [1], [0, 0, 1, 1], [], []>} : vector<8x128xbf16>, vector<128x128xbf16>, vector<8x128xf32> -> vector<8x128xf32>
        %79 = arith.addf %76, %78 : vector<8x128xf32>
        %c0_47 = arith.constant 0 : index
        %c0_48 = arith.constant 0 : index
        %80 = vector.load %arg17[%c0_47, %c0_48] : memref<8x128xf32, #tpu.memory_space<vmem>>, vector<8x128xf32>
        tpu.vector_store %arg17[%c0_47, %c0_48], %79 {strides = array<i32>} : memref<8x128xf32, #tpu.memory_space<vmem>>, vector<8x128xf32>,
        %c0_i32_49 = arith.constant 0 : i32
        %81 = arith.cmpi eq, %arg1, %c0_i32_49 : i32
        %82 = arith.extui %81 : i1 to i32
        %c0_i32_50 = arith.constant 0 : i32
        %83 = arith.cmpi ne, %82, %c0_i32_50 : i32
        scf.if %83 {
          %c0_51 = arith.constant 0 : index
          %c0_52 = arith.constant 0 : index
          %84 = vector.load %arg17[%c0_51, %c0_52] : memref<8x128xf32, #tpu.memory_space<vmem>>, vector<8x128xf32>
          %85 = arith.truncf %84 : vector<8x128xf32> to vector<8x128xbf16>
          %c0_53 = arith.constant 0 : index
          %c0_54 = arith.constant 0 : index
          %86 = vector.load %arg10[%c0_53, %c0_54] : memref<128x128xbf16, #tpu.memory_space<vmem>>, vector<128x128xbf16>
          %cst_55 = arith.constant dense<0.000000e+00> : vector<8x128xf32>
          %87 = tpu.matmul %85, %86, %cst_55 {dimension_numbers = #tpu.dot_dimension_numbers<[1], [0], [0], [1], [0, 0, 1, 1], [], []>} : vector<8x128xbf16>, vector<128x128xbf16>, vector<8x128xf32> -> vector<8x128xf32>
          %c0_56 = arith.constant 0 : index
          %c0_57 = arith.constant 0 : index
          %88 = vector.load %arg11[%c0_56, %c0_57] : memref<1x128xf32, #tpu.memory_space<vmem>>, vector<1x128xf32>
          %89 = vector.broadcast %88 : vector<1x128xf32> to vector<8x128xf32>
          %90 = arith.addf %87, %89 : vector<8x128xf32>
          %cst_58 = arith.constant 0.000000e+00 : f32
          %91 = vector.broadcast %cst_58 : f32 to vector<8x128xf32>
          %92 = arith.maximumf %90, %91 : vector<8x128xf32>
          %93 = arith.truncf %92 : vector<8x128xf32> to vector<8x128xbf16>
          %c0_59 = arith.constant 0 : index
          %c0_60 = arith.constant 0 : index
          %94 = vector.load %arg12[%c0_59, %c0_60] : memref<128x128xbf16, #tpu.memory_space<vmem>>, vector<128x128xbf16>
          %cst_61 = arith.constant dense<0.000000e+00> : vector<8x128xf32>
          %95 = tpu.matmul %93, %94, %cst_61 {dimension_numbers = #tpu.dot_dimension_numbers<[1], [0], [0], [1], [0, 0, 1, 1], [], []>} : vector<8x128xbf16>, vector<128x128xbf16>, vector<8x128xf32> -> vector<8x128xf32>
          %c0_62 = arith.constant 0 : index
          %c0_63 = arith.constant 0 : index
          %96 = vector.load %arg13[%c0_62, %c0_63] : memref<1x128xf32, #tpu.memory_space<vmem>>, vector<1x128xf32>
          %97 = vector.broadcast %96 : vector<1x128xf32> to vector<8x128xf32>
          %98 = arith.addf %95, %97 : vector<8x128xf32>
          %c0_64 = arith.constant 0 : index
          %c0_65 = arith.constant 0 : index
          %99 = vector.load %arg14[%c0_64, %c0_65] : memref<8x128xf32, #tpu.memory_space<vmem>>, vector<8x128xf32>
          tpu.vector_store %arg14[%c0_64, %c0_65], %98 {strides = array<i32>} : memref<8x128xf32, #tpu.memory_space<vmem>>, vector<8x128xf32>,
        } else {
        }
      } else {
      }
    } else {
    }
    return
  }
  func.func @transform_0(%arg0: i32, %arg1: i32) -> i32 {
    %c0_i32 = arith.constant 0 : i32
    %c0_i32_0 = arith.constant 0 : i32
    return %c0_i32 : i32
  }
  func.func @transform_2(%arg0: i32, %arg1: i32) -> (i32, i32) {
    %c0_i32 = arith.constant 0 : i32
    %c0_i32_0 = arith.constant 0 : i32
    return %arg1, %c0_i32 : i32, i32
  }
  func.func @transform_3(%arg0: i32, %arg1: i32) -> (i32, i32) {
    %c2_i32 = arith.constant 2 : i32
    %0 = arith.cmpi eq, %arg0, %c2_i32 : i32
    %c0_i32 = arith.constant 0 : i32
    %1 = arith.select %0, %arg1, %c0_i32 : i32
    %c0_i32_0 = arith.constant 0 : i32
    %c0_i32_1 = arith.constant 0 : i32
    return %c0_i32_0, %1 : i32, i32
  }
  func.func @transform_4(%arg0: i32, %arg1: i32) -> (i32, i32, i32) {
    %c0_i32 = arith.constant 0 : i32
    %c0_i32_0 = arith.constant 0 : i32
    %c0_i32_1 = arith.constant 0 : i32
    return %arg0, %c0_i32, %c0_i32_0 : i32, i32, i32
  }
  func.func @transform_5(%arg0: i32, %arg1: i32) -> (i32, i32, i32) {
    %c0_i32 = arith.constant 0 : i32
    %c0_i32_0 = arith.constant 0 : i32
    %c0_i32_1 = arith.constant 0 : i32
    return %arg0, %c0_i32, %c0_i32_0 : i32, i32, i32
  }
  func.func @transform_6(%arg0: i32, %arg1: i32) -> (i32, i32, i32) {
    %c0_i32 = arith.constant 0 : i32
    %c0_i32_0 = arith.constant 0 : i32
    %c0_i32_1 = arith.constant 0 : i32
    return %arg0, %c0_i32, %c0_i32_0 : i32, i32, i32
  }
  func.func @transform_7(%arg0: i32, %arg1: i32) -> (i32, i32, i32) {
    %c0_i32 = arith.constant 0 : i32
    %c0_i32_0 = arith.constant 0 : i32
    %c0_i32_1 = arith.constant 0 : i32
    return %arg0, %c0_i32, %c0_i32_0 : i32, i32, i32
  }
  func.func @transform_8(%arg0: i32, %arg1: i32) -> (i32, i32) {
    %c0_i32 = arith.constant 0 : i32
    %c0_i32_0 = arith.constant 0 : i32
    %c0_i32_1 = arith.constant 0 : i32
    return %c0_i32, %c0_i32_0 : i32, i32
  }
  func.func @transform_9(%arg0: i32, %arg1: i32) -> (i32, i32) {
    %c0_i32 = arith.constant 0 : i32
    %c0_i32_0 = arith.constant 0 : i32
    %c0_i32_1 = arith.constant 0 : i32
    return %c0_i32, %c0_i32_0 : i32, i32
  }
  func.func @transform_10(%arg0: i32, %arg1: i32) -> (i32, i32) {
    %c0_i32 = arith.constant 0 : i32
    %c0_i32_0 = arith.constant 0 : i32
    %c0_i32_1 = arith.constant 0 : i32
    return %c0_i32, %c0_i32_0 : i32, i32
  }
  func.func @transform_11(%arg0: i32, %arg1: i32) -> (i32, i32) {
    %c0_i32 = arith.constant 0 : i32
    %c0_i32_0 = arith.constant 0 : i32
    %c0_i32_1 = arith.constant 0 : i32
    return %c0_i32, %c0_i32_0 : i32, i32
  }
  func.func @transform_12(%arg0: i32, %arg1: i32) -> (i32, i32) {
    %c0_i32 = arith.constant 0 : i32
    %c0_i32_0 = arith.constant 0 : i32
    %c0_i32_1 = arith.constant 0 : i32
    return %c0_i32, %c0_i32_0 : i32, i32
  }
}

</mosaic_0001>

<bundles_post_ra>
// kernel: tpu_custom_call.1
= control target key start
LH: loop header
LB: loop body
LE: loop exit
PB: predicated region body
PF: predicated region fallthrough
CT: control target
= control target key end

     0   :  { %s4360_s0 = inlined_call_operand.hbm [shape: f32[3], index: 0, kind: input, shape index: {}]   ;;  %s4361_s1 = inlined_call_operand.hbm [shape: bf16[128,128], index: 1, kind: input, shape index: {}]   ;;  %s4362_s2 = inlined_call_operand.hbm [shape: s8[128,128], index: 2, kind: input, shape index: {}]   ;;  %s4363_s3 = inlined_call_operand.vmem [shape: bf16[8,128], index: 3, kind: input, shape index: {}]   ;;  %s4364_s4 = inlined_call_operand.hbm [shape: bf16[3,128,128], index: 4, kind: input, shape index: {}]   ;;  %s4365_s5 = inlined_call_operand.vmem [shape: f32[3,1,128], index: 5, kind: input, shape index: {}]   ;;  %s4366_s6 = inlined_call_operand.hbm [shape: bf16[3,128,128], index: 6, kind: input, shape index: {}]   ;;  %s4367_s7 = inlined_call_operand.vmem [shape: f32[3,1,128], index: 7, kind: input, shape index: {}]   ;;  %s4368_s8 = inlined_call_operand.hbm [shape: bf16[128,128], index: 8, kind: input, shape index: {}]   ;;  %s4369_s9 = inlined_call_operand.vmem [shape: f32[1,128], index: 9, kind: input, shape index: {}]   ;;  %s4370_s10 = inlined_call_operand.hbm [shape: bf16[128,128], index: 10, kind: input, shape index: {}]   ;;  %s4371_s11 = inlined_call_operand.vmem [shape: f32[1,128], index: 11, kind: input, shape index: {}]   ;;  %s4372_s12 = inlined_call_operand.hbm [shape: f32[8,128], index: 12, kind: output, shape index: {}]  }
   0x1   :  { %4392 = sst [smem:[#allocation33_spill]] %s4360_s0 }
   0x2   :  { %4393 = sst [smem:[#allocation34_spill]] %s4361_s1 }
   0x3   :  { %4394 = sst [smem:[#allocation35_spill]] %s4363_s3 }
   0x4   :  { %4395 = sst [smem:[#allocation36_spill]] %s4364_s4 }
   0x5   :  { %4396 = sst [smem:[#allocation37_spill]] %s4367_s7 }
   0x6   :  { %4397 = sst [smem:[#allocation38_spill]] %s4368_s8 }
   0x7   :  { %4398 = sst [smem:[#allocation39_spill]] %s4369_s9 }
   0x8   :  { %4399 = sst [smem:[#allocation40_spill]] %s4371_s11 }
   0x9   :  { %4400 = sst [smem:[#allocation41_spill]] %s4372_s12 }
   0xa   :  { %17 = vsyncpa [#allocation9], 0 }
   0xb   :  { %18 = vsyncpa [#allocation7], 0 }
   0xc   :  { %19 = vsyncpa [#allocation12], 0 }
   0xd   :  { %21 = vsyncpa [#allocation12 + $0x1], 0 }
   0xe   :  { %22 = vsyncpa [#allocation15], 0 }
   0xf   :  { %23 = vsyncpa [#allocation8], 0  ;;  %s3649_s21 = smov 0   ;;  %s3651_s22 = smov 0  }
  0x10   :  { %s3653_s23 = smov 0   ;;  %s3655_s24 = smov 0  }
  0x11   :  { %s3657_s25 = smov 0   ;;  %s3659_s26 = smov 0  }
  0x12 LB: > { %4401 = sst [smem:[#allocation28_spill]] %s3554_s23  ;;  %s3678_s27 = sadd.s32 4294967295, %s3566_s26   ;;  %s3566_s26 = sphi %s3659_s26, %s29_s26   ;;  %s3562_s25 = sphi %s3657_s25, %s4443_s25   ;;  %s3558_s24 = sphi %s3655_s24, %s4446_s24   ;;  %s3554_s23 = sphi %s3653_s23, %s4441_s23   ;;  %s3550_s22 = sphi %s3651_s22, %s4445_s22   ;;  %s3546_s21 = sphi %s3649_s21, %s4444_s21  }
  0x13   : > { %4402 = sst [smem:[#allocation29_spill]] %s3562_s25  ;;  %p138_p0 = scmp.ne.s32.totalorder %s3550_s22, %s3546_s21 }
  0x14   : > { %4403 = sst [smem:[#allocation30_spill]] %s3566_s26  ;;  %p4374_p1 = scmp.eq.s32.totalorder %s3678_s27, 0 }
  0x15   : > { %p2502_p2 = scmp.ge.s32.totalorder %s3566_s26, 1  ;;  %p332_p3 = scmp.lt.s32.totalorder %s3566_s26, 4 }
  0x16   : > { %p3686_p4 = por %p4374_p1, %p138_p0  ;;  %s3568_s30 = smov [#allocation14]  }
  0x17   : > { %p3690_p5 = pnand %p2502_p2, %p332_p3  ;;  %s369_s13 = sshll.u32 %s3568_s30, 4  ;;  %s370_s13 = int_to_ptr.vmem [resolvable:$true] %s369_s13 }
  0x18   : > { %s4404_s28 = scalar_select %p3686_p4, 1, 0 }
  0x19   : > { %s4405_s29 = scalar_select %p3690_p5, 1, 0 }
  0x1a   : > { %p3130_p6 = pneg %p3690_p5  ;;  %s41_s15 = sadd.s32 1, %s3562_s25 }
  0x1b   : > { %s4407_s8 = sld [smem:[#allocation38_spill]] }
  0x1c   : > { %p3698_p7 = pnand %p3130_p6, %p4374_p1 }
  0x1e   : > { %s4406_s14 = scalar_select %p3698_p7, 1, 0 }
  0x1f   : > { %p3711_p9 = pneg %p3698_p7 }
  0x21   : > { %s3287_s18 = scalar_lea.hbm %s4407_s8, 1024 }
  0x22   : > { %p3288_p8 = scmp.ne.s32.totalorder %s4407_s8, %s3287_s18  ;;  %p3294_p12 = scmp.lt.u32.totalorder %s3287_s18, %s4407_s8 }
  0x24   : > { %p3290_p10 = pnand %p3711_p9, %p3288_p8 }
  0x26   : > { %p3291_p11 = pneg %p3290_p10 }
  0x28   : > { %p3296_p13 = pnand %p3294_p12, %p3291_p11 }
  0x2a   : > { %3299 = shalt.err (!%p3296_p13)
}
  0x2b   : > { %s3300_s16 = scalar_lea.vmem %s370_s13, 1024  ;;  %p3308_p6 = scmp.lt.s32.totalorder %s370_s13, %s370_s13 }
  0x2c   : > { %p3301_p0 = scmp.ne.s32.totalorder %s370_s13, %s3300_s16  ;;  %p3309_p1 = scmp.lt.s32.totalorder %s3300_s16, %s3300_s16 }
  0x2e   : > { %p3303_p2 = pnand %p3301_p0, %p3711_p9  ;;  %p3310_p4 = por %p3309_p1, %p3308_p6 }
  0x30   : > { %p3304_p3 = pneg %p3303_p2 }
  0x32   : > { %p3311_p5 = pnand %p3310_p4, %p3304_p3 }
  0x34   : > { %3314 = shalt.err (!%p3311_p5)
}
  0x35   : > { %s4378_s17 = smov 64   ;;  %s4381_s12 = smov 4  }
  0x36   : > { %3139 = dma.hbm_to_vmem [thread:$0]  (!%p3698_p7), %s4407_s8, 1024, %s370_s13, [#allocation15], %s4378_s17, %s4378_s17, %s4381_s12  }
  0x37   : > { %p43_p1 = scmp.ge.s32.totalorder %s41_s15, 3  ;;  %s125_s20 = sadd.s32 1, %s3554_s23 }
  0x38   : > { %p132_p4 = scmp.ne.s32.totalorder %s3554_s23, %s3550_s22  ;;  %p133_p5 = scmp.eq.s32.totalorder %s3566_s26, 0 }
  0x39   : > { %s4448_s15 = smov (%p43_p1, %s41_s15), 0  ;;  %p3154_p10 = scmp.lt.s32.totalorder %s3566_s26, 3 }
  0x3a   : > { %4409 = sst [smem:[#allocation31_spill]] %s4448_s15  ;;  %p134_p8 = por %p133_p5, %p132_p4 }
  0x3b   : > { %s122_s30 = ssub.s32 %s3562_s25, %s4448_s15  ;;  %s413_s16 = sand.u32 1, %s3566_s26  }
  0x3c   : > { %p123_p11 = scmp.eq.s32.totalorder %s122_s30, 0  ;;  %s415_s11 = sand.u32 1, %s3554_s23  }
  0x3d   : > { %s4380_s9 = sshll.u32 %s3562_s25, 10  ;;  %s3745_s1 = sshll.u32 %s415_s11, 6 }
  0x3e   : > { %s3743_s3 = scalar_select %p123_p11, %s3554_s23, %s125_s20  }
  0x3f   : > { %s4411_s4 = sld [smem:[#allocation36_spill]]  ;;  %p3754_p12 = pnand %p3154_p10, %p134_p8 }
  0x40   : > { %4410 = sst [smem:[#allocation32_spill]] %s3743_s3  ;;  %s417_s20 = scalar_lea.vmem [#allocation11], %s3745_s1 }
  0x41   : > { %s4412_s17 = scalar_select %p3754_p12, 1, 0 }
  0x42   : > { %s424_s11 = sshll.u32 %s417_s20, 4  ;;  %s3761_s30 = scalar_lea.sflag [#allocation12], %s413_s16  ;;  %s3759_s11 = int_to_ptr.vmem [resolvable:$true] %s424_s11 }
  0x43   : > { %p4388_p0 = pneg %p3754_p12 }
  0x45   : > { %s3752_s19 = scalar_lea.hbm %s4411_s4, %s4380_s9  ;;  %s3320_s12 = scalar_lea.hbm %s4411_s4, 3072 }
  0x46   : > { %s3315_s13 = scalar_lea.hbm %s3752_s19, 1024  ;;  %p3321_p6 = scmp.lt.u32.totalorder %s3752_s19, %s4411_s4 }
  0x47   : > { %p3316_p13 = scmp.ne.s32.totalorder %s3752_s19, %s3315_s13  ;;  %p3322_p1 = scmp.lt.u32.totalorder %s3320_s12, %s3315_s13 }
  0x48   : > { %p3324_p5 = scmp.lt.u32.totalorder %s3315_s13, %s3752_s19 }
  0x49   : > { %p3318_p2 = pnand %p4388_p0, %p3316_p13  ;;  %p3323_p4 = por %p3322_p1, %p3321_p6 }
  0x4b   : > { %p3319_p3 = pneg %p3318_p2  ;;  %p3325_p8 = por %p3324_p5, %p3323_p4 }
  0x4d   : > { %p3326_p10 = pnand %p3325_p8, %p3319_p3 }
  0x4f   : > { %3329 = shalt.err (!%p3326_p10)
}
  0x50   : > { %s3330_s16 = scalar_lea.vmem %s3759_s11, 1024  ;;  %s3571_s9 = smov [#allocation11]  }
  0x51   : > { %p3331_p11 = scmp.ne.s32.totalorder %s3759_s11, %s3330_s16  ;;  %s3335_s20 = sshll.u32 %s3571_s9, 4  ;;  %s3336_s20 = int_to_ptr.vmem [resolvable:$false] %s3335_s20 }
  0x52   : > { %s3337_s8 = scalar_lea.vmem %s3336_s20, 2048  ;;  %p3338_p7 = scmp.lt.s32.totalorder %s3759_s11, %s3336_s20 }
  0x53   : > { %p3333_p13 = pnand %p3331_p11, %p4388_p0  ;;  %p3339_p6 = scmp.lt.s32.totalorder %s3337_s8, %s3330_s16 }
  0x55   : > { %p3334_p2 = pneg %p3333_p13  ;;  %p3340_p1 = por %p3339_p6, %p3338_p7 }
  0x57   : > { %p3341_p4 = pnand %p3340_p1, %p3334_p2 }
  0x59   : > { %3344 = shalt.err (!%p3341_p4)
}
  0x5a   : > { %s4413_s15 = smov 4   ;;  %s4414_s12 = smov 64  }
  0x5b   : > { %3146 = dma.hbm_to_vmem [thread:$0]  (!%p3754_p12), %s3752_s19, 1024, %s3759_s11, %s3761_s30, %s4414_s12, %s4414_s12, %s4413_s15  }
  0x5c   : > { %s4415_s13 = sshll.u32 %s3562_s25, 10  ;;  %s444_s20 = scalar_lea.vmem [#allocation13], %s3745_s1 }
  0x5d   : > { %s3797_s16 = scalar_lea.hbm %s4366_s6, %s4415_s13  ;;  %s3800_s8 = sshll.u32 %s444_s20, 4  ;;  %s3837_s8 = int_to_ptr.vmem [resolvable:$true] %s3800_s8 }
  0x5e   : > { %s4416_s0 = sld [smem:[#allocation33_spill]] }
  0x64   : > { %s3345_s23 = scalar_lea.hbm %s4416_s0, 16 }
  0x65   : > { %p3346_p7 = scmp.ne.s32.totalorder %s4416_s0, %s3345_s23  ;;  %p3352_p8 = scmp.lt.u32.totalorder %s3345_s23, %s4416_s0 }
  0x67   : > { %p3348_p3 = pnand %p3346_p7, %p3711_p9 }
  0x69   : > { %p3349_p5 = pneg %p3348_p3 }
  0x6b   : > { %p3354_p10 = pnand %p3352_p8, %p3349_p5 }
  0x6d   : > { %3357 = shalt.err (!%p3354_p10)
}
  0x6e   : > { %s3572_s1 = smov [#allocation6]   ;;  %p4417_p11 = scmp.ne.s32.totalorder %s4406_s14, 0 }
  0x6f   : > { %s3573_s3 = smov [#allocation10]   ;;  %s3358_s9 = scalar_lea.hbm %s4362_s2, 512 }
  0x70   : > { %3133 = dma.hbm_to_smem (!%p4417_p11), %s4416_s0, 16, %s3572_s1, [#allocation9]  }
  0x71   : > { %s356_s4 = sshll.u32 %s3573_s3, 4  ;;  %p3359_p13 = scmp.ne.s32.totalorder %s4362_s2, %s3358_s9  ;;  %s357_s4 = int_to_ptr.vmem [resolvable:$true] %s356_s4 }
  0x72   : > { %p3365_p1 = scmp.lt.u32.totalorder %s3358_s9, %s4362_s2 }
  0x73   : > { %p3361_p2 = pnand %p3359_p13, %p3711_p9 }
  0x75   : > { %p3362_p6 = pneg %p3361_p2 }
  0x77   : > { %p3367_p4 = pnand %p3365_p1, %p3362_p6 }
  0x79   : > { %3370 = shalt.err (!%p3367_p4)
}
  0x7a   : > { %s3371_s1 = scalar_lea.vmem %s357_s4, 512  ;;  %p3379_p8 = scmp.lt.s32.totalorder %s357_s4, %s357_s4 }
  0x7b   : > { %p3372_p7 = scmp.ne.s32.totalorder %s357_s4, %s3371_s1  ;;  %p3380_p10 = scmp.lt.s32.totalorder %s3371_s1, %s3371_s1 }
  0x7d   : > { %p3374_p3 = pnand %p3372_p7, %p3711_p9  ;;  %p3381_p0 = por %p3380_p10, %p3379_p8 }
  0x7f   : > { %p3375_p5 = pneg %p3374_p3 }
  0x81   : > { %p3382_p12 = pnand %p3381_p0, %p3375_p5 }
  0x83   : > { %3385 = shalt.err (!%p3382_p12)
}
  0x84   : > { %s3574_s13 = smov 128   ;;  %s3575_s18 = smov 8  }
  0x85   : > { %3136 = dma.hbm_to_vmem [thread:$0]  (!%p4417_p11), %s4362_s2, 512, %s357_s4, [#allocation7], %s3574_s13, %s3574_s13, %s3575_s18  }
  0x86   : > { %s3576_s26 = smov [#allocation16]   ;;  %s3386_s23 = scalar_lea.hbm %s4370_s10, 1024 }
  0x87   : > { %s385_s9 = sshll.u32 %s3576_s26, 4  ;;  %p3387_p12 = scmp.ne.s32.totalorder %s4370_s10, %s3386_s23  ;;  %s386_s9 = int_to_ptr.vmem [resolvable:$true] %s385_s9 }
  0x88   : > { %p3393_p2 = scmp.lt.u32.totalorder %s3386_s23, %s4370_s10 }
  0x89   : > { %p3389_p0 = pnand %p3387_p12, %p3711_p9 }
  0x8b   : > { %p3390_p13 = pneg %p3389_p0 }
  0x8d   : > { %p3395_p6 = pnand %p3393_p2, %p3390_p13 }
  0x8f   : > { %3398 = shalt.err (!%p3395_p6)
}
  0x90   : > { %s3399_s4 = scalar_lea.vmem %s386_s9, 1024  ;;  %p3407_p3 = scmp.lt.s32.totalorder %s386_s9, %s386_s9 }
  0x91   : > { %p3400_p1 = scmp.ne.s32.totalorder %s386_s9, %s3399_s4  ;;  %p3408_p5 = scmp.lt.s32.totalorder %s3399_s4, %s3399_s4 }
  0x93   : > { %p3402_p4 = pnand %p3400_p1, %p3711_p9  ;;  %p3409_p8 = por %p3408_p5, %p3407_p3 }
  0x95   : > { %p3403_p7 = pneg %p3402_p4 }
  0x97   : > { %p3410_p10 = pnand %p3409_p8, %p3403_p7 }
  0x99   : > { %3413 = shalt.err (!%p3410_p10)
}
  0x9a   : > { %3142 = dma.hbm_to_vmem [thread:$0]  (!%p4417_p11), %s4370_s10, 1024, %s386_s9, [#allocation15], %s4414_s12, %s4414_s12, %s4413_s15  }
  0x9b   : > { %s3414_s21 = scalar_lea.hbm %s3797_s16, 1024  ;;  %p4418_p12 = scmp.ne.s32.totalorder %s4412_s17, 0 }
  0x9c   : > { %p3415_p9 = scmp.ne.s32.totalorder %s3797_s16, %s3414_s21  ;;  %s3419_s18 = scalar_lea.hbm %s4366_s6, 3072 }
  0x9d   : > { %p4419_p0 = pneg %p4418_p12  ;;  %p3420_p6 = scmp.lt.u32.totalorder %s3797_s16, %s4366_s6 }
  0x9e   : > { %p3421_p1 = scmp.lt.u32.totalorder %s3419_s18, %s3414_s21  ;;  %p3423_p7 = scmp.lt.u32.totalorder %s3414_s21, %s3797_s16 }
  0x9f   : > { %p3417_p13 = pnand %p3415_p9, %p4419_p0 }
  0xa0   : > { %p3422_p4 = por %p3421_p1, %p3420_p6 }
  0xa1   : > { %p3418_p2 = pneg %p3417_p13 }
  0xa2   : > { %p3424_p3 = por %p3423_p7, %p3422_p4 }
  0xa4   : > { %p3425_p5 = pnand %p3424_p3, %p3418_p2 }
  0xa6   : > { %3428 = shalt.err (!%p3425_p5)
}
  0xa7   : > { %s3429_s26 = scalar_lea.vmem %s3837_s8, 1024  ;;  %p4420_p8 = pmov %p4419_p0 }
  0xa8   : > { %p3430_p11 = scmp.ne.s32.totalorder %s3837_s8, %s3429_s26  ;;  %s3577_s9 = smov [#allocation13]  }
  0xa9   : > { %s3434_s20 = sshll.u32 %s3577_s9, 4  ;;  %s3435_s20 = int_to_ptr.vmem [resolvable:$false] %s3434_s20 }
  0xaa   : > { %p3432_p10 = pnand %p3430_p11, %p4420_p8  ;;  %s3436_s19 = scalar_lea.vmem %s3435_s20, 2048 }
  0xab   : > { %p3437_p0 = scmp.lt.s32.totalorder %s3837_s8, %s3435_s20  ;;  %p3438_p13 = scmp.lt.s32.totalorder %s3436_s19, %s3429_s26 }
  0xac   : > { %p3433_p9 = pneg %p3432_p10 }
  0xad   : > { %p3439_p6 = por %p3438_p13, %p3437_p0 }
  0xaf   : > { %p3440_p1 = pnand %p3439_p6, %p3433_p9 }
  0xb1   : > { %3443 = shalt.err (!%p3440_p1)
}
  0xb2   : > { %3149 = dma.hbm_to_vmem [thread:$0]  (!%p4418_p12), %s3797_s16, 1024, %s3837_s8, %s3761_s30, %s4414_s12, %s4414_s12, %s4413_s15  }
  0xb3   : > { %p4421_p2 = scmp.ne.s32.totalorder %s4405_s29, 0 }
  0xb4   : > { %p4422_p4 = scmp.eq.s32.totalorder (!%p4421_p2), %s3678_s27, 0 }
  0xb5   : > { %469 = sbr.rel (%p4421_p2) target bundleno = 3022 (0xbce), region = 64 }
  0xbc   : > { %3521 = dma.done.wait (%p4422_p4), [#allocation9], 16   ;;  %p4423_p7 = pmov %p4422_p4 }
  0xbd   : > { %p4424_p3 = pmov %p4422_p4 }
  0xbe   : > { %3523 = vsyncadd (%p4423_p7), [#allocation9], 4294967280 }
  0xbf   : > { %3525 = dma.done.wait (%p4424_p3), [#allocation7], 512   ;;  %p4425_p5 = pmov %p4424_p3 }
  0xc0   : > { %s479_s17 = sand.u32 1, %s3678_s27   ;;  %s481_s30 = sand.u32 1, %s3550_s22  }
  0xc1   : > { %3527 = vsyncadd (%p4425_p5), [#allocation7], 4294966784  ;;  %s2518_s15 = sshll.u32 %s481_s30, 6  ;;  %s480_s29 = scalar_lea.sflag [#allocation12], %s479_s17 }
  0xc2   : > { %s3899_s12 = scalar_lea.vmem [#allocation11], %s2518_s15  ;;  %p4426_p12 = scmp.ne.s32.totalorder %s4404_s28, 0 }
  0xc4   : > { %3529 = dma.done.wait (%p4426_p12), %s480_s29, 2048  }
  0xc5   : > { %3531 = vsyncadd (%p4426_p12), %s480_s29, 4294965248  ;;  %s3905_s16 = scalar_lea.vmem [#allocation13], %s2518_s15  ;;  %p4427_p11 = pmov %p4424_p3 }
  0xc6   : > { %p4428_p8 = pmov %p4424_p3 }
  0xc7   : > { %3533 = dma.done.wait (%p4427_p11), [#allocation15], 2048  }
  0xc8   : > { %3535 = vsyncadd (%p4428_p8), [#allocation15], 4294965248 }
  0xc9   : > { %505 = sfence }
  0xca   : > { %p561_p10 = scmp.lt.s32.totalorder %s3558_s24, 2  ;;  %p568_p9 = scmp.eq.s32.totalorder %s3558_s24, 0 }
  0xcb   : > { %s3578_s23 = smov [#allocation3]   ;;  %s4429_s21 = sld [smem:[#allocation37_spill]] }
  0xcc   : > { %s562_s8 = scalar_select %p561_p10, %s3558_s24, 2 }
  0xcd   : > { %s581_s11 = sshll.u32 %s3578_s23, 4  ;;  %s4430_s3 = sld [smem:[#allocation34_spill]]  ;;  %s582_s11 = int_to_ptr.vmem [resolvable:$true] %s581_s11 }
  0xce   : > { %s3917_s4 = scalar_lea.vmem %s4365_s5, %s562_s8 }
  0xd1   : > { %s3922_s13 = scalar_lea.vmem %s4429_s21, %s562_s8 }
  0xd3   : > { %s3444_s7 = scalar_lea.hbm %s4430_s3, 1024 }
  0xd4   : > { %p3445_p0 = scmp.ne.s32.totalorder %s4430_s3, %s3444_s7  ;;  %p3450_p1 = scmp.lt.u32.totalorder %s3444_s7, %s4430_s3 }
  0xd6   : > { %p3446_p13 = pnand %p3445_p0, %p568_p9 }
  0xd8   : > { %p3447_p6 = pneg %p3446_p13 }
  0xda   : > { %p3452_p2 = pnand %p3450_p1, %p3447_p6 }
  0xdc   : > { %3455 = shalt.err (!%p3452_p2)  }
  0xdd   : > { %s3456_s17 = scalar_lea.vmem %s582_s11, 1024  ;;  %p3463_p5 = scmp.lt.s32.totalorder %s582_s11, %s582_s11 }
  0xde   : > { %p3457_p4 = scmp.ne.s32.totalorder %s582_s11, %s3456_s17  ;;  %p3464_p12 = scmp.lt.s32.totalorder %s3456_s17, %s3456_s17 }
  0xe0   : > { %p3458_p7 = pnand %p3457_p4, %p568_p9  ;;  %p3465_p11 = por %p3464_p12, %p3463_p5 }
  0xe2   : > { %p3459_p3 = pneg %p3458_p7 }
  0xe4   : > { %p3466_p8 = pnand %p3465_p11, %p3459_p3 }
  0xe6   : > { %3469 = shalt.err (!%p3466_p8)  }
  0xe7   : > { %3124 = dma.hbm_to_vmem [thread:$0]  (%p568_p9), %s4430_s3, 1024, %s582_s11, [#allocation5] }
  0xe8   : > { %3537 = dma.done.wait (%p568_p9), [#allocation5], 1024 }
  0xe9   : > { %3539 = vsyncadd (%p568_p9), [#allocation5], 4294966272  ;;  %p602_p10 = scmp.lt.s32.totalorder %s3558_s24, 0  ;;  %s603_s29 = ssub.s32 0, %s3558_s24  ;;  %v3949_v0 = vld [vmem:[#allocation10] sm:$0xff]  ;;  %v3951_v1 = vld [vmem:[#allocation10 + $0x8] sm:$0xff] }
  0xea   : > { %s2523_s8 = smin.u32 %s3558_s24, %s603_s29  ;;  %v3953_v2 = vld [vmem:[#allocation10 + $0x10] sm:$0xff]  ;;  %v3955_v3 = vld [vmem:[#allocation10 + $0x18] sm:$0xff]  ;;  %v594_v4 = vunpack.c.l.s8.bf16 %v3949_v0  ;;  %v595_v5 = vunpack.c.h.s8.bf16 %v3949_v0  ;;  %v596_v6 = vunpack.c.l.s8.bf16 %v3951_v1  ;;  %v597_v7 = vunpack.c.h.s8.bf16 %v3951_v1 }
  0xeb   : > { %s605_s23 = sand.u32 1, %s2523_s8   ;;  %v598_v8 = vunpack.c.l.s8.bf16 %v3953_v2  ;;  %v599_v9 = vunpack.c.h.s8.bf16 %v3953_v2  ;;  %v600_v10 = vunpack.c.l.s8.bf16 %v3955_v3  ;;  %v601_v11 = vunpack.c.h.s8.bf16 %v3955_v3 }
  0xec   : > { %s606_s28 = ssub.s32 0, %s605_s23 }
  0xed   : > { %s4450_s28 = smov (!%p602_p10, %s606_s28), %s605_s23 }
  0xee   : > { %p2525_p0 = scmp.lt.s32.totalorder %s4450_s28, 0  ;;  %s612_s1 = sadd.s32 2, %s4450_s28 }
  0xf0   : > { %s4452_s1 = smov (!%p2525_p0, %s612_s1), %s4450_s28 }
  0xf1   : > { %p2526_p9 = scmp.ne.s32.totalorder %s4452_s1, 0 }
  0xf2   : > { %v3968_v12 = vld [vmem:[#allocation3] sm:$0xff] (!%p2526_p9)  ;;  %v3970_v13 = vld [vmem:[#allocation3 + $0x8] sm:$0xff] (!%p2526_p9)  ;;  %2776 = vmatprep.mubr.bf16.mxu0 (!%p2526_p9), %v594_v4  ;;  %v3976_v14 = vld [vmem:[#allocation3 + $0x10] sm:$0xff] (!%p2526_p9)  ;;  %s751_s11 = sld [smem:[#allocation6 + %s3558_s24]] (!%p2526_p9)  ;;  %p2545_p13 = scmp.ne.s32.totalorder (!%p2526_p9), %s3558_s24, 2 }
  0xf3   : > { %617 = sbr.rel (%p2526_p9) target bundleno = 1616 (0x650), region = 100  ;;  %2760 = vmatprep.subr.bf16.mxu0 (!%p2526_p9), %v3968_v12  ;;  %v3223_v15 = vld [vmem:[%s3899_s12] sm:$0xff] (!%p2526_p9)   ;;  %v3224_v16 = vld [vmem:[%s3899_s12 + $0x8] sm:$0xff] (!%p2526_p9)   ;;  %v3225_v17 = vld [vmem:[%s3899_s12 + $0x10] sm:$0xff] (!%p2526_p9)   ;;  %v737_v34 = vunpack.c.l.bf16 (!%p2526_p9), %v3970_v13  ;;  %v738_v35 = vunpack.c.h.bf16 (!%p2526_p9), %v3970_v13  ;;  %v735_v37 = vunpack.c.l.bf16 (!%p2526_p9), %v3968_v12  ;;  %v736_v38 = vunpack.c.h.bf16 (!%p2526_p9), %v3968_v12 }
  0xf4   : > { %2761 = vmatpush3.bf16.msra.mxu0 (!%p2526_p9), %v3968_v12  ;;  %2792 = vmatprep.subr.bf16.mxu1 (!%p2526_p9), %v3223_v15  ;;  %v3984_v18 = vld [vmem:[#allocation3 + $0x18] sm:$0xff] (!%p2526_p9)  ;;  %v3988_v20 = vld [vmem:[#allocation3 + $0x20] sm:$0xff] (!%p2526_p9)  ;;  %v3994_v22 = vld [vmem:[#allocation3 + $0x28] sm:$0xff] (!%p2526_p9)  ;;  %v739_v53 = vunpack.c.l.bf16 (!%p2526_p9), %v3976_v14  ;;  %v740_v54 = vunpack.c.h.bf16 (!%p2526_p9), %v3976_v14 }
  0xf5   : > { %2762 = vmatprep.subr.bf16.mxu0 (!%p2526_p9), %v3970_v13  ;;  %2793 = vmatpush3.bf16.msra.mxu1 (!%p2526_p9), %v3223_v15  ;;  %v3226_v19 = vld [vmem:[%s3899_s12 + $0x18] sm:$0xff] (!%p2526_p9)   ;;  %v3227_v21 = vld [vmem:[%s3899_s12 + $0x20] sm:$0xff] (!%p2526_p9)   ;;  %v3228_v23 = vld [vmem:[%s3899_s12 + $0x28] sm:$0xff] (!%p2526_p9)   ;;  %v741_v49 = vunpack.c.l.bf16 (!%p2526_p9), %v3984_v18  ;;  %v742_v50 = vunpack.c.h.bf16 (!%p2526_p9), %v3984_v18 }
  0xf6   : > { %2794 = vmatprep.subr.bf16.mxu1 (!%p2526_p9), %v3224_v16  ;;  %v3999_v24 = vld [vmem:[#allocation3 + $0x30] sm:$0xff] (!%p2526_p9)  ;;  %v4003_v25 = vld [vmem:[#allocation3 + $0x38] sm:$0xff] (!%p2526_p9)  ;;  %v3231_v28 = vld [vmem:[%s3905_s16] sm:$0xff] (!%p2526_p9)  }
  0xf7   : > { %v3229_v26 = vld [vmem:[%s3899_s12 + $0x30] sm:$0xff] (!%p2526_p9)   ;;  %v3230_v27 = vld [vmem:[%s3899_s12 + $0x38] sm:$0xff] (!%p2526_p9)   ;;  %v4026_v29 = vld [vmem:[%s3905_s16 + $0x8] sm:$0xff] (!%p2526_p9)  }
  0xf8   : > { %2763 = vmatpush3.bf16.msra.mxu0 (!%p2526_p9), %v3970_v13  ;;  %v4030_v30 = vld [vmem:[%s3905_s16 + $0x10] sm:$0xff] (!%p2526_p9)   ;;  %v4035_v31 = vld [vmem:[%s3905_s16 + $0x18] sm:$0xff] (!%p2526_p9)   ;;  %v4040_v32 = vld [vmem:[%s3905_s16 + $0x20] sm:$0xff] (!%p2526_p9)   ;;  %s752_s0 = sadd.f32 (!%p2526_p9), 1.0, %s751_s11 }
  0xf9   : > { %2764 = vmatprep.subr.bf16.mxu0 (!%p2526_p9), %v3976_v14  ;;  %2795 = vmatpush3.bf16.msra.mxu1 (!%p2526_p9), %v3224_v16  ;;  %v4045_v33 = vld [vmem:[%s3905_s16 + $0x28] sm:$0xff] (!%p2526_p9)   ;;  %v746_v16 = vunpack.c.h.bf16 (!%p2526_p9), %v3994_v22 }
  0xfa   : > { %2796 = vmatprep.subr.bf16.mxu1 %v3225_v17  ;;  %v4053_v36 = vstv %s752_s0  ;;  %vm3580_vm0 = vmmov (!%p2545_p13), 0   ;;  %s4431_s14 = sld [smem:[#allocation35_spill]] (!%p2545_p13)  ;;  %s4432_s26 = sld [smem:[#allocation39_spill]] (!%p2545_p13) }
  0xfb   : > { %v756_v39 = vmul.f32 %v4053_v36, %v737_v34  ;;  %v757_v40 = vmul.f32 %v4053_v36, %v738_v35  ;;  %v754_v42 = vmul.f32 %v4053_v36, %v735_v37  ;;  %v755_v43 = vmul.f32 %v4053_v36, %v736_v38  ;;  %s4433_s19 = sld [smem:[#allocation40_spill]] (!%p2545_p13) }
  0xfc   : > { %2765 = vmatpush3.bf16.msra.mxu0 %v3976_v14  ;;  %v760_v57 = vmul.f32 %v4053_v36, %v741_v49  ;;  %v761_v58 = vmul.f32 %v4053_v36, %v742_v50  ;;  %v758_v60 = vmul.f32 %v4053_v36, %v739_v53  ;;  %v759_v61 = vmul.f32 %v4053_v36, %v740_v54 }
  0xfd   : > { %2766 = vmatprep.subr.bf16.mxu0 %v3984_v18  ;;  %2797 = vmatpush3.bf16.msra.mxu1 %v3225_v17  ;;  %v745_v14 = vunpack.c.l.bf16 %v3994_v22 }
  0xfe   : > { %2798 = vmatprep.subr.bf16.mxu1 %v3226_v19 }
 0x100   : > { %2767 = vmatpush3.bf16.msra.mxu0 %v3984_v18 }
 0x101   : > { %2768 = vmatprep.subr.bf16.mxu0 %v3988_v20  ;;  %2799 = vmatpush3.bf16.msra.mxu1 %v3226_v19  ;;  %v743_v19 = vunpack.c.l.bf16 %v3988_v20 }
 0x102   : > { %2800 = vmatprep.subr.bf16.mxu1 %v3227_v21 }
 0x104   : > { %2769 = vmatpush3.bf16.msra.mxu0 %v3988_v20 }
 0x105   : > { %2770 = vmatprep.subr.bf16.mxu0 %v3994_v22  ;;  %2801 = vmatpush3.bf16.msra.mxu1 %v3227_v21  ;;  %v744_v21 = vunpack.c.h.bf16 %v3988_v20 }
 0x106   : > { %2802 = vmatprep.subr.bf16.mxu1 %v3228_v23 }
 0x107   : > { %v763_v35 = vmul.f32 %v4053_v36, %v744_v21 }
 0x108   : > { %2771 = vmatpush3.bf16.msra.mxu0 %v3994_v22  ;;  %v762_v22 = vmul.f32 %v4053_v36, %v743_v19 }
 0x109   : > { %2772 = vmatprep.subr.bf16.mxu0 %v3999_v24  ;;  %2803 = vmatpush3.bf16.msra.mxu1 %v3228_v23 }
 0x10a   : > { %2804 = vmatprep.subr.bf16.mxu1 %v3229_v26 }
 0x10c   : > { %2773 = vmatpush3.bf16.msra.mxu0 %v3999_v24 }
 0x10d   : > { %2774 = vmatprep.subr.bf16.mxu0 %v4003_v25  ;;  %2805 = vmatpush3.bf16.msra.mxu1 %v3229_v26 }
 0x10e   : > { %2806 = vmatprep.subr.bf16.mxu1 %v3230_v27 }
 0x110   : > { %2775 = vmatpush3.bf16.msra.mxu0 %v4003_v25 }
 0x111   : > { %2807 = vmatpush3.bf16.msra.mxu1 %v3230_v27  ;;  %2824 = vmatprep.subr.bf16.mxu0 %v3231_v28  ;;  %v764_v27 = vmul.f32 %v4053_v36, %v745_v14 }
 0x112   : > { %3072 = vmatprep.subr.bf16.mxu1 %v3231_v28 }
 0x113   : > { %2777 = vmatmul.mubr.bf16.vlgmr.msra.gmra.mrb[0].mxu0 %v595_v5 }
 0x114   : > { %2780 = vmatprep.mubr.bf16.mxu0 %v596_v6  ;;  %2825 = vmatpush3.bf16.msra.mxu0 %v3231_v28 }
 0x115   : > { %2826 = vmatprep.subr.bf16.mxu0 %v4026_v29 }
 0x118   : > { %2827 = vmatpush3.bf16.msra.mxu0 %v4026_v29 }
 0x119   : > { %2828 = vmatprep.subr.bf16.mxu0 %v4030_v30 }
 0x11b   : > { %2781 = vmatmul.mubr.bf16.gmra.mrb[4].mxu0 %v597_v7 }
 0x11c   : > { %2784 = vmatprep.mubr.bf16.mxu0 %v598_v8  ;;  %2829 = vmatpush3.bf16.msra.mxu0 %v4030_v30 }
 0x11d   : > { %2830 = vmatprep.subr.bf16.mxu0 %v4035_v31 }
 0x120   : > { %2831 = vmatpush3.bf16.msra.mxu0 %v4035_v31 }
 0x121   : > { %2832 = vmatprep.subr.bf16.mxu0 %v4040_v32 }
 0x123   : > { %2785 = vmatmul.mubr.bf16.gmra.mrb[8].mxu0 %v599_v9 }
 0x124   : > { %2788 = vmatprep.mubr.bf16.mxu0 %v600_v10  ;;  %2833 = vmatpush3.bf16.msra.mxu0 %v4040_v32 }
 0x125   : > { %2834 = vmatprep.subr.bf16.mxu0 %v4045_v33 }
 0x128   : > { %2835 = vmatpush3.bf16.msra.mxu0 %v4045_v33 }
 0x12b   : > { %2789 = vmatmul.mubr.bf16.gmra.mrb[12].mxu0 %v601_v11 }
 0x1e6   : > { %v2778_v41 = vpop.f32.mrb[0].mxu0 }
 0x1e7   : > { %v660_v44 = vpop.f32.mrb[1].mxu0  ;;  %v772_v46 = vadd.f32 %v2778_v41, %v756_v39  ;;  %v750_v41 = vunpack.c.h.bf16 %v4003_v25 }
 0x1e8   : > { %v2779_v45 = vpop.f32.mrb[2].mxu0  ;;  %v770_v51 = vadd.f32 %v754_v42, %v660_v44  ;;  %v747_v44 = vunpack.c.l.bf16 %v3999_v24 }
 0x1e9   : > { %v773_v47 = vadd.f32 %v2779_v45, %v757_v40  ;;  %v663_v48 = vpop.f32.mrb[3].mxu0  ;;  %v749_v40 = vunpack.c.l.bf16 %v4003_v25  ;;  %v748_v45 = vunpack.c.h.bf16 %v3999_v24 }
 0x1ea   : > { %v771_v52 = vadd.f32 %v755_v43, %v663_v48  ;;  %v769_v48 = vmul.f32 %v4053_v36, %v750_v41  ;;  %v766_v25 = vmul.f32 %v4053_v36, %v747_v44 }
 0x1eb   : > { %v787_v55 = vpack.c.bf16 %v773_v47, %v772_v46  ;;  %v767_v50 = vmul.f32 %v4053_v36, %v748_v45 }
 0x1ec   : > { %v786_v56 = vpack.c.bf16 %v771_v52, %v770_v51 }
 0x1ee   : > { %v2782_v59 = vpop.f32.mrb[4].mxu0  ;;  %2808 = vmatprep.mubr.bf16.mxu1 %v786_v56 }
 0x1ef   : > { %v676_v62 = vpop.f32.mrb[5].mxu0  ;;  %2809 = vmatmul.mubr.bf16.vlgmr.msra.gmra.mrb[0].mxu1 %v787_v55  ;;  %v776_v12 = vadd.f32 %v2782_v59, %v760_v57 }
 0x1f0   : > { %v2783_v63 = vpop.f32.mrb[6].mxu0  ;;  %3080 = vmatpush3.bf16.msra.mxu1 %v3231_v28  ;;  %v774_v17 = vadd.f32 %v758_v60, %v676_v62  ;;  %v765_v28 = vmul.f32 %v4053_v36, %v746_v16 }
 0x1f1   : > { %v777_v13 = vadd.f32 %v2783_v63, %v761_v58  ;;  %v679_v15 = vpop.f32.mrb[7].mxu0  ;;  %3073 = vmatprep.subr.bf16.mxu1 %v4026_v29  ;;  %v2527_v58 = vld [vmem:[%s3917_s4] ss:$0 sm:$0xff] }
 0x1f2   : > { %v775_v18 = vadd.f32 %v759_v61, %v679_v15 }
 0x1f3   : > { %v789_v23 = vpack.c.bf16 %v777_v13, %v776_v12 }
 0x1f4   : > { %v788_v26 = vpack.c.bf16 %v775_v18, %v774_v17  ;;  %3081 = vmatpush3.bf16.msra.mxu1 %v4026_v29 }
 0x1f5   : > { %3074 = vmatprep.subr.bf16.mxu1 %v4030_v30 }
 0x1f6   : > { %v2786_v34 = vpop.f32.mrb[8].mxu0  ;;  %2812 = vmatprep.mubr.bf16.mxu1 %v788_v26 }
 0x1f7   : > { %v692_v37 = vpop.f32.mrb[9].mxu0  ;;  %2813 = vmatmul.mubr.bf16.gmra.mrb[4].mxu1 %v789_v23  ;;  %v780_v20 = vadd.f32 %v2786_v34, %v764_v27 }
 0x1f8   : > { %v2787_v38 = vpop.f32.mrb[10].mxu0  ;;  %3082 = vmatpush3.bf16.msra.mxu1 %v4030_v30  ;;  %v778_v42 = vadd.f32 %v762_v22, %v692_v37  ;;  %v768_v30 = vmul.f32 %v4053_v36, %v749_v40  ;;  %v3237_v36 = vld [vmem:[%s3905_s16 + $0x30] sm:$0xff]  }
 0x1f9   : > { %v781_v39 = vadd.f32 %v2787_v38, %v765_v28  ;;  %v695_v29 = vpop.f32.mrb[11].mxu0  ;;  %3075 = vmatprep.subr.bf16.mxu1 %v4035_v31  ;;  %2836 = vmatprep.subr.bf16.mxu0 %v3237_v36 }
 0x1fa   : > { %v779_v43 = vadd.f32 %v763_v35, %v695_v29  ;;  %2837 = vmatpush3.bf16.msra.mxu0 %v3237_v36 }
 0x1fb   : > { %v791_v46 = vpack.c.bf16 %v781_v39, %v780_v20 }
 0x1fc   : > { %v790_v47 = vpack.c.bf16 %v779_v43, %v778_v42  ;;  %3083 = vmatpush3.bf16.msra.mxu1 %v4035_v31 }
 0x1fd   : > { %3076 = vmatprep.subr.bf16.mxu1 %v4040_v32 }
 0x1fe   : > { %v2790_v49 = vpop.f32.mrb[12].mxu0  ;;  %2816 = vmatprep.mubr.bf16.mxu1 %v790_v47 }
 0x1ff   : > { %v708_v51 = vpop.f32.mrb[13].mxu0  ;;  %2817 = vmatmul.mubr.bf16.gmra.mrb[8].mxu1 %v791_v46  ;;  %v784_v52 = vadd.f32 %v2790_v49, %v768_v30 }
 0x200   : > { %v2791_v24 = vpop.f32.mrb[14].mxu0  ;;  %3084 = vmatpush3.bf16.msra.mxu1 %v4040_v32  ;;  %v782_v54 = vadd.f32 %v766_v25, %v708_v51  ;;  %v3238_v32 = vld [vmem:[%s3905_s16 + $0x38] sm:$0xff]  }
 0x201   : > { %v785_v31 = vadd.f32 %v2791_v24, %v769_v48  ;;  %v711_v53 = vpop.f32.mrb[15].mxu0  ;;  %3077 = vmatprep.subr.bf16.mxu1 %v4045_v33  ;;  %2838 = vmatprep.subr.bf16.mxu0 %v3238_v32 }
 0x202   : > { %v783_v55 = vadd.f32 %v767_v50, %v711_v53  ;;  %2839 = vmatpush3.bf16.msra.mxu0 %v3238_v32 }
 0x203   : > { %v793_v56 = vpack.c.bf16 %v785_v31, %v784_v52 }
 0x204   : > { %v792_v57 = vpack.c.bf16 %v783_v55, %v782_v54  ;;  %3085 = vmatpush3.bf16.msra.mxu1 %v4045_v33 }
 0x205   : > { %3078 = vmatprep.subr.bf16.mxu1 %v3237_v36 }
 0x206   : > { %2820 = vmatprep.mubr.bf16.mxu1 %v792_v57 }
 0x207   : > { %2821 = vmatmul.mubr.bf16.gmra.mrb[12].mxu1 %v793_v56 }
 0x208   : > { %3086 = vmatpush3.bf16.msra.mxu1 %v3237_v36 }
 0x209   : > { %3079 = vmatprep.subr.bf16.mxu1 %v3238_v32 }
 0x20c   : > { %3087 = vmatpush3.bf16.msra.mxu1 %v3238_v32 }
 0x2c2   : > { %v2810_v59 = vpop.f32.mrb[0].mxu1 }
 0x2c3   : > { %v908_v60 = vadd.f32 %v2810_v59, %v2527_v58  ;;  %v899_v61 = vpop.f32.mrb[1].mxu1 }
 0x2c4   : > { %v900_v62 = vadd.f32 %v2527_v58, %v899_v61  ;;  %v2811_v63 = vpop.f32.mrb[2].mxu1 }
 0x2c5   : > { %v911_v12 = vadd.f32 %v2811_v63, %v2527_v58  ;;  %v902_v33 = vpop.f32.mrb[3].mxu1  ;;  %v964_v15 = vmax.f32 %v908_v60, 0.0 }
 0x2c6   : > { %v903_v13 = vadd.f32 %v2527_v58, %v902_v33  ;;  %v962_v16 = vmax.f32 %v900_v62, 0.0 }
 0x2c7   : > { %v965_v14 = vmax.f32 %v911_v12, 0.0  ;;  %v2536_v12 = vld [vmem:[%s3922_s13] ss:$0 sm:$0xff] }
 0x2c8   : > { %v963_v17 = vmax.f32 %v903_v13, 0.0 }
 0x2c9   : > { %v979_v18 = vpack.c.bf16 %v965_v14, %v964_v15 }
 0x2ca   : > { %v978_v19 = vpack.c.bf16 %v963_v17, %v962_v16  ;;  %v2814_v21 = vpop.f32.mrb[4].mxu1 }
 0x2cb   : > { %v924_v23 = vadd.f32 %v2814_v21, %v2527_v58  ;;  %v915_v26 = vpop.f32.mrb[5].mxu1 }
 0x2cc   : > { %v916_v27 = vadd.f32 %v2527_v58, %v915_v26  ;;  %v2815_v28 = vpop.f32.mrb[6].mxu1  ;;  %2840 = vmatprep.mubr.bf16.mxu0 %v978_v19 }
 0x2cd   : > { %v927_v34 = vadd.f32 %v2815_v28, %v2527_v58  ;;  %v918_v22 = vpop.f32.mrb[7].mxu1  ;;  %2841 = vmatmul.mubr.bf16.vlgmr.msra.gmra.mrb[16].mxu0 %v979_v18  ;;  %v968_v37 = vmax.f32 %v924_v23, 0.0 }
 0x2ce   : > { %v919_v35 = vadd.f32 %v2527_v58, %v918_v22  ;;  %v966_v20 = vmax.f32 %v916_v27, 0.0 }
 0x2cf   : > { %v969_v38 = vmax.f32 %v927_v34, 0.0 }
 0x2d0   : > { %v967_v39 = vmax.f32 %v919_v35, 0.0 }
 0x2d1   : > { %v981_v29 = vpack.c.bf16 %v969_v38, %v968_v37 }
 0x2d2   : > { %v980_v40 = vpack.c.bf16 %v967_v39, %v966_v20  ;;  %v2818_v41 = vpop.f32.mrb[8].mxu1 }
 0x2d3   : > { %v940_v42 = vadd.f32 %v2818_v41, %v2527_v58  ;;  %v931_v43 = vpop.f32.mrb[9].mxu1 }
 0x2d4   : > { %v932_v44 = vadd.f32 %v2527_v58, %v931_v43  ;;  %v2819_v45 = vpop.f32.mrb[10].mxu1  ;;  %2844 = vmatprep.mubr.bf16.mxu0 %v980_v40 }
 0x2d5   : > { %v943_v46 = vadd.f32 %v2819_v45, %v2527_v58  ;;  %v934_v47 = vpop.f32.mrb[11].mxu1  ;;  %2845 = vmatmul.mubr.bf16.gmra.mrb[20].mxu0 %v981_v29  ;;  %v972_v48 = vmax.f32 %v940_v42, 0.0 }
 0x2d6   : > { %v935_v30 = vadd.f32 %v2527_v58, %v934_v47  ;;  %v970_v25 = vmax.f32 %v932_v44, 0.0 }
 0x2d7   : > { %v973_v49 = vmax.f32 %v943_v46, 0.0 }
 0x2d8   : > { %v971_v50 = vmax.f32 %v935_v30, 0.0 }
 0x2d9   : > { %v983_v51 = vpack.c.bf16 %v973_v49, %v972_v48 }
 0x2da   : > { %v982_v24 = vpack.c.bf16 %v971_v50, %v970_v25  ;;  %v2822_v52 = vpop.f32.mrb[12].mxu1 }
 0x2db   : > { %v956_v31 = vadd.f32 %v2822_v52, %v2527_v58  ;;  %v947_v53 = vpop.f32.mrb[13].mxu1 }
 0x2dc   : > { %v948_v54 = vadd.f32 %v2527_v58, %v947_v53  ;;  %v2823_v55 = vpop.f32.mrb[14].mxu1  ;;  %2848 = vmatprep.mubr.bf16.mxu1 %v982_v24 }
 0x2dd   : > { %v959_v56 = vadd.f32 %v2823_v55, %v2527_v58  ;;  %v950_v57 = vpop.f32.mrb[15].mxu1  ;;  %2849 = vmatmul.mubr.bf16.vlgmr.msra.gmra.mrb[16].mxu1 %v983_v51  ;;  %v976_v32 = vmax.f32 %v956_v31, 0.0 }
 0x2de   : > { %v951_v36 = vadd.f32 %v2527_v58, %v950_v57  ;;  %v974_v60 = vmax.f32 %v948_v54, 0.0 }
 0x2df   : > { %v977_v59 = vmax.f32 %v959_v56, 0.0 }
 0x2e0   : > { %v975_v61 = vmax.f32 %v951_v36, 0.0 }
 0x2e1   : > { %v985_v62 = vpack.c.bf16 %v977_v59, %v976_v32 }
 0x2e2   : > { %v984_v63 = vpack.c.bf16 %v975_v61, %v974_v60 }
 0x2e4   : > { %2852 = vmatprep.mubr.bf16.mxu1 %v984_v63 }
 0x2e5   : > { %2853 = vmatmul.mubr.bf16.gmra.mrb[20].mxu1 %v985_v62 }
 0x3a0   : > { %v2842_v33 = vpop.f32.mrb[16].mxu0 }
 0x3a1   : > { %v1100_v13 = vadd.f32 %v2842_v33, %v2536_v12  ;;  %v1091_v15 = vpop.f32.mrb[17].mxu0 }
 0x3a2   : > { %v1092_v14 = vadd.f32 %v2536_v12, %v1091_v15  ;;  %v2843_v16 = vpop.f32.mrb[18].mxu0 }
 0x3a3   : > { %v1103_v17 = vadd.f32 %v2843_v16, %v2536_v12  ;;  %v1094_v18 = vpop.f32.mrb[19].mxu0  ;;  %v1156_v21 = vmax.f32 %v1100_v13, 0.0 }
 0x3a4   : > { %v1095_v19 = vadd.f32 %v2536_v12, %v1094_v18  ;;  %v1154_v58 = vmax.f32 %v1092_v14, 0.0  ;;  %v3239_v18 = vld [vmem:[#allocation14] sm:$0xff] (!%p2545_p13)  }
 0x3a5   : > { %v1157_v23 = vmax.f32 %v1103_v17, 0.0  ;;  %v3579_v17 = vmov (!%p2545_p13), 0.0  }
 0x3a6   : > { %v1155_v26 = vmax.f32 %v1095_v19, 0.0  ;;  %2856 = vmatprep.subr.bf16.mxu0 (!%p2545_p13), %v3579_v17  ;;  %2872 = vmatprep.mubr.msk.bf16.mxu0 (!%p2545_p13), %vm3580_vm0, %v3579_v17  ;;  %v3241_v19 = vld [vmem:[#allocation14 + $0x10] sm:$0xff] (!%p2545_p13)  }
 0x3a7   : > { %v4099_v27 = vpack.c.bf16 %v1157_v23, %v1156_v21  ;;  %2876 = vmatprep.subr.bf16.mxu1 (!%p2545_p13), %v3579_v17  ;;  %2892 = vmatprep.mubr.msk.bf16.mxu1 (!%p2545_p13), %vm3580_vm0, %v3579_v17  ;;  %v3242_v21 = vld [vmem:[#allocation14 + $0x18] sm:$0xff] (!%p2545_p13)   ;;  %v3243_v23 = vld [vmem:[#allocation14 + $0x20] sm:$0xff] (!%p2545_p13)  }
 0x3a8   : > { %v1170_v28 = vpack.c.bf16 %v1155_v26, %v1154_v58  ;;  %v2846_v34 = vpop.f32.mrb[20].mxu0  ;;  %2877 = vmatpush3.bf16.msra.mxu1 (!%p2545_p13), %v3239_v18  ;;  %v1197_v58 = vld [vmem:[%s4431_s14] sm:$0xf] (!%p2545_p13) }
 0x3a9   : > { %1181 = vst [vmem:[#allocation2 + $0x8] sm:$0xff] %v4099_v27  ;;  %v1116_v22 = vadd.f32 %v2846_v34, %v2536_v12  ;;  %v1107_v35 = vpop.f32.mrb[21].mxu0  ;;  %2878 = vmatprep.subr.bf16.mxu1 (!%p2545_p13), %v3579_v17  ;;  %v3244_v26 = vld [vmem:[#allocation14 + $0x28] sm:$0xff] (!%p2545_p13)   ;;  %v3247_v34 = vld [vmem:[#allocation16] sm:$0xff] (!%p2545_p13)  }
 0x3aa   : > { %1180 = vst [vmem:[#allocation2] sm:$0xff] %v1170_v28  ;;  %v1108_v37 = vadd.f32 %v2536_v12, %v1107_v35  ;;  %v2847_v38 = vpop.f32.mrb[22].mxu0  ;;  %2857 = vmatpush3.bf16.msra.mxu0 (!%p2545_p13), %v1170_v28  ;;  %v3246_v28 = vld [vmem:[#allocation14 + $0x38] sm:$0xff] (!%p2545_p13)   ;;  %v3249_v35 = vld [vmem:[#allocation16 + $0x10] sm:$0xff] (!%p2545_p13)  }
 0x3ab   : > { %v1119_v20 = vadd.f32 %v2847_v38, %v2536_v12  ;;  %v1110_v39 = vpop.f32.mrb[23].mxu0  ;;  %v1160_v40 = vmax.f32 %v1116_v22, 0.0  ;;  %2858 = vmatprep.subr.bf16.mxu0 (!%p2545_p13), %v3579_v17  ;;  %v3248_v22 = vld [vmem:[#allocation16 + $0x8] sm:$0xff] (!%p2545_p13)   ;;  %v3251_v38 = vld [vmem:[#allocation16 + $0x20] sm:$0xff] (!%p2545_p13)  }
 0x3ac   : > { %v1111_v29 = vadd.f32 %v2536_v12, %v1110_v39  ;;  %v1158_v42 = vmax.f32 %v1108_v37, 0.0  ;;  %v3250_v37 = vld [vmem:[#allocation16 + $0x18] sm:$0xff] (!%p2545_p13)  }
 0x3ad   : > { %v1161_v41 = vmax.f32 %v1119_v20, 0.0  ;;  %v3252_v20 = vld [vmem:[#allocation16 + $0x28] sm:$0xff] (!%p2545_p13)  }
 0x3ae   : > { %v1159_v43 = vmax.f32 %v1111_v29, 0.0  ;;  %2859 = vmatpush3.bf16.msra.mxu0 (!%p2545_p13), %v4099_v27  ;;  %v3245_v27 = vld [vmem:[#allocation14 + $0x30] sm:$0xff] (!%p2545_p13)  }
 0x3af   : > { %v1173_v44 = vpack.c.bf16 %v1161_v41, %v1160_v40  ;;  %2860 = vmatprep.subr.bf16.mxu0 (!%p2545_p13), %v3579_v17 }
 0x3b0   : > { %v1172_v45 = vpack.c.bf16 %v1159_v43, %v1158_v42  ;;  %v2850_v46 = vpop.f32.mrb[16].mxu1  ;;  %v3253_v43 = vld [vmem:[#allocation16 + $0x30] sm:$0xff] (!%p2545_p13)  }
 0x3b1   : > { %1183 = vst [vmem:[#allocation2 + $0x18] sm:$0xff] %v1173_v44  ;;  %v1132_v47 = vadd.f32 %v2850_v46, %v2536_v12  ;;  %v1123_v30 = vpop.f32.mrb[17].mxu1 }
 0x3b2   : > { %1182 = vst [vmem:[#allocation2 + $0x10] sm:$0xff] %v1172_v45  ;;  %v1124_v48 = vadd.f32 %v2536_v12, %v1123_v30  ;;  %v2851_v49 = vpop.f32.mrb[18].mxu1  ;;  %2861 = vmatpush3.bf16.msra.mxu0 (!%p2545_p13), %v1172_v45  ;;  %v2546_v45 = vld [vmem:[%s4432_s26] ss:$0 sm:$0xff] (!%p2545_p13) }
 0x3b3   : > { %v1135_v25 = vadd.f32 %v2851_v49, %v2536_v12  ;;  %v1126_v50 = vpop.f32.mrb[19].mxu1  ;;  %v1164_v24 = vmax.f32 %v1132_v47, 0.0  ;;  %2862 = vmatprep.subr.bf16.mxu0 (!%p2545_p13), %v3579_v17 }
 0x3b4   : > { %v1127_v51 = vadd.f32 %v2536_v12, %v1126_v50  ;;  %v1162_v31 = vmax.f32 %v1124_v48, 0.0 }
 0x3b5   : > { %v1165_v52 = vmax.f32 %v1135_v25, 0.0 }
 0x3b6   : > { %v1163_v53 = vmax.f32 %v1127_v51, 0.0  ;;  %2863 = vmatpush3.bf16.msra.mxu0 (!%p2545_p13), %v1173_v44  ;;  %v3254_v44 = vld [vmem:[#allocation16 + $0x38] sm:$0xff] (!%p2545_p13)   ;;  %v2555_v51 = vld [vmem:[%s4433_s19] ss:$0 sm:$0xff] (!%p2545_p13) }
 0x3b7   : > { %v1175_v54 = vpack.c.bf16 %v1165_v52, %v1164_v24  ;;  %2864 = vmatprep.subr.bf16.mxu0 (!%p2545_p13), %v3579_v17 }
 0x3b8   : > { %v1174_v55 = vpack.c.bf16 %v1163_v53, %v1162_v31  ;;  %v2854_v56 = vpop.f32.mrb[20].mxu1 }
 0x3b9   : > { %1185 = vst [vmem:[#allocation2 + $0x28] sm:$0xff] %v1175_v54  ;;  %v1148_v57 = vadd.f32 %v2854_v56, %v2536_v12  ;;  %v1139_v36 = vpop.f32.mrb[21].mxu1 }
 0x3ba   : > { %1184 = vst [vmem:[#allocation2 + $0x20] sm:$0xff] %v1174_v55  ;;  %v1140_v32 = vadd.f32 %v2536_v12, %v1139_v36  ;;  %v2855_v59 = vpop.f32.mrb[22].mxu1  ;;  %2865 = vmatpush3.bf16.msra.mxu0 (!%p2545_p13), %v1174_v55 }
 0x3bb   : > { %v1151_v60 = vadd.f32 %v2855_v59, %v2536_v12  ;;  %v1142_v61 = vpop.f32.mrb[23].mxu1  ;;  %v1168_v63 = vmax.f32 %v1148_v57, 0.0  ;;  %2866 = vmatprep.subr.bf16.mxu0 (!%p2545_p13), %v3579_v17 }
 0x3bc   : > { %v1143_v62 = vadd.f32 %v2536_v12, %v1142_v61  ;;  %v1166_v13 = vmax.f32 %v1140_v32, 0.0  ;;  %1191 = sbr.rel (%p2545_p13) target bundleno = 1616 (0x650), region = 104  ;;  %v3240_v12 = vld [vmem:[#allocation14 + $0x8] sm:$0xff] (!%p2545_p13)  }
 0x3bd   : > { %v1169_v33 = vmax.f32 %v1151_v60, 0.0  ;;  %2879 = vmatpush3.bf16.msra.mxu1 (!%p2545_p13), %v3240_v12 }
 0x3be   : > { %v1167_v15 = vmax.f32 %v1143_v62, 0.0  ;;  %2880 = vmatprep.subr.bf16.mxu1 (!%p2545_p13), %v3579_v17  ;;  %2867 = vmatpush3.bf16.msra.mxu0 (!%p2545_p13), %v1175_v54 }
 0x3bf   : > { %v1177_v14 = vpack.c.bf16 %v1169_v33, %v1168_v63  ;;  %2868 = vmatprep.subr.bf16.mxu0 (!%p2545_p13), %v3579_v17 }
 0x3c0   : > { %v1176_v16 = vpack.c.bf16 %v1167_v15, %v1166_v13 }
 0x3c1   : > { %1187 = vst [vmem:[#allocation2 + $0x38] sm:$0xff] %v1177_v14  ;;  %2881 = vmatpush3.bf16.msra.mxu1 (!%p2545_p13), %v3241_v19 }
 0x3c2   : > { %1186 = vst [vmem:[#allocation2 + $0x30] sm:$0xff] %v1176_v16  ;;  %2882 = vmatprep.subr.bf16.mxu1 (!%p2545_p13), %v3579_v17  ;;  %2869 = vmatpush3.bf16.msra.mxu0 (!%p2545_p13), %v1176_v16 }
 0x3c3   : > { %2870 = vmatprep.subr.bf16.mxu0 %v3579_v17 }
 0x3c5   : > { %2883 = vmatpush3.bf16.msra.mxu1 %v3242_v21 }
 0x3c6   : > { %2884 = vmatprep.subr.bf16.mxu1 %v3579_v17  ;;  %2871 = vmatpush3.bf16.msra.mxu0 %v1177_v14 }
 0x3c7   : > { %2896 = vmatprep.subr.bf16.mxu0 %v3579_v17 }
 0x3c9   : > { %2885 = vmatpush3.bf16.msra.mxu1 %v3243_v23  ;;  %2873 = vmatmul.mubr.bf16.vlgmr.msra.gmra.mrb[0].mxu0 %v1197_v58 }
 0x3ca   : > { %2886 = vmatprep.subr.bf16.mxu1 %v3579_v17  ;;  %2912 = vmatprep.mubr.msk.bf16.mxu0 %vm3580_vm0, %v3579_v17 }
 0x3cb   : > { %2897 = vmatpush3.bf16.msra.mxu0 %v3247_v34 }
 0x3cc   : > { %2898 = vmatprep.subr.bf16.mxu0 %v3579_v17 }
 0x3cd   : > { %2887 = vmatpush3.bf16.msra.mxu1 %v3244_v26 }
 0x3ce   : > { %2888 = vmatprep.subr.bf16.mxu1 %v3579_v17 }
 0x3cf   : > { %2899 = vmatpush3.bf16.msra.mxu0 %v3248_v22 }
 0x3d0   : > { %2900 = vmatprep.subr.bf16.mxu0 %v3579_v17 }
 0x3d1   : > { %2889 = vmatpush3.bf16.msra.mxu1 %v3245_v27 }
 0x3d2   : > { %2890 = vmatprep.subr.bf16.mxu1 %v3579_v17 }
 0x3d3   : > { %2901 = vmatpush3.bf16.msra.mxu0 %v3249_v35 }
 0x3d4   : > { %2902 = vmatprep.subr.bf16.mxu0 %v3579_v17 }
 0x3d5   : > { %2891 = vmatpush3.bf16.msra.mxu1 %v3246_v28 }
 0x3d7   : > { %2903 = vmatpush3.bf16.msra.mxu0 %v3250_v37 }
 0x3d8   : > { %2904 = vmatprep.subr.bf16.mxu0 %v3579_v17 }
 0x3db   : > { %2905 = vmatpush3.bf16.msra.mxu0 %v3251_v38 }
 0x3dc   : > { %2906 = vmatprep.subr.bf16.mxu0 %v3579_v17 }
 0x3df   : > { %2907 = vmatpush3.bf16.msra.mxu0 %v3252_v20 }
 0x3e0   : > { %2908 = vmatprep.subr.bf16.mxu0 %v3579_v17 }
 0x3e3   : > { %2909 = vmatpush3.bf16.msra.mxu0 %v3253_v43 }
 0x3e4   : > { %2910 = vmatprep.subr.bf16.mxu0 %v3579_v17 }
 0x3e7   : > { %2911 = vmatpush3.bf16.msra.mxu0 %v3254_v44 }
 0x49c   : > { %v1232_v39 = vpop.f32.mrb[0].mxu0 }
 0x49d   : > { %v2874_v29 = vpop.f32.mrb[1].mxu0  ;;  %v1244_v42 = vpack.c.bf16 %v1232_v39, %v1232_v39 }
 0x49e   : > { %v1235_v40 = vpop.f32.mrb[2].mxu0 }
 0x49f   : > { %v2875_v41 = vpop.f32.mrb[3].mxu0  ;;  %2893 = vmatmul.mubr.bf16.vlgmr.msra.gmra.mrb[0].mxu1 %v1244_v42 }
 0x572   : > { %v1350_v46 = vpop.f32.mrb[0].mxu1 }
 0x573   : > { %v1351_v47 = vadd.f32 %v2546_v45, %v1350_v46  ;;  %v2894_v30 = vpop.f32.mrb[1].mxu1 }
 0x574   : > { %v1353_v48 = vpop.f32.mrb[2].mxu1 }
 0x575   : > { %v1356_v49 = vmax.f32 %v1351_v47, 0.0  ;;  %v2895_v25 = vpop.f32.mrb[3].mxu1 }
 0x577   : > { %v1357_v50 = vpack.c.bf16 %v1356_v49, %v1356_v49 }
 0x579   : > { %2913 = vmatmul.mubr.bf16.vlgmr.msra.gmra.mrb[4].mxu0 %v1357_v50 }
 0x64c   : > { %v1463_v24 = vpop.f32.mrb[4].mxu0 }
 0x64d   : > { %v1464_v52 = vadd.f32 %v2555_v51, %v1463_v24  ;;  %v2914_v31 = vpop.f32.mrb[5].mxu0 }
 0x64e   : > { %v1466_v53 = vpop.f32.mrb[6].mxu0 }
 0x64f   : > { %1469 = vst [vmem:[#allocation17] sm:$0xff] %v1464_v52  ;;  %v2915_v54 = vpop.f32.mrb[7].mxu0 }
 0x650 PF: > { %p2564_p6 = scmp.ne.s32.totalorder %s4452_s1, 1 }
 0x651   : > { %v4144_v55 = vld [vmem:[#allocation2] sm:$0xff] (!%p2564_p6)  ;;  %v4146_v56 = vld [vmem:[#allocation2 + $0x8] sm:$0xff] (!%p2564_p6)  ;;  %2932 = vmatprep.mubr.bf16.mxu0 (!%p2564_p6), %v594_v4  ;;  %v4152_v57 = vld [vmem:[#allocation2 + $0x10] sm:$0xff] (!%p2564_p6)  ;;  %p2583_p1 = scmp.ne.s32.totalorder (!%p2564_p6), %s3558_s24, 2 }
 0x652   : > { %1473 = sbr.rel (%p2564_p6) target bundleno = 2991 (0xbaf), region = 116  ;;  %2916 = vmatprep.subr.bf16.mxu0 (!%p2564_p6), %v4144_v55  ;;  %v3255_v36 = vld [vmem:[%s3899_s12] sm:$0xff] (!%p2564_p6)   ;;  %v3256_v32 = vld [vmem:[%s3899_s12 + $0x8] sm:$0xff] (!%p2564_p6)   ;;  %v3257_v59 = vld [vmem:[%s3899_s12 + $0x10] sm:$0xff] (!%p2564_p6)   ;;  %v1591_v14 = vunpack.c.l.bf16 (!%p2564_p6), %v4144_v55  ;;  %v1592_v16 = vunpack.c.h.bf16 (!%p2564_p6), %v4144_v55  ;;  %v1595_v38 = vunpack.c.l.bf16 (!%p2564_p6), %v4152_v57  ;;  %v1596_v20 = vunpack.c.h.bf16 (!%p2564_p6), %v4152_v57 }
 0x653   : > { %2917 = vmatpush3.bf16.msra.mxu0 (!%p2564_p6), %v4144_v55  ;;  %2948 = vmatprep.subr.bf16.mxu1 (!%p2564_p6), %v3255_v36  ;;  %v4160_v4 = vld [vmem:[#allocation2 + $0x18] sm:$0xff] (!%p2564_p6)  ;;  %v4164_v61 = vld [vmem:[#allocation2 + $0x20] sm:$0xff] (!%p2564_p6)  ;;  %v4170_v63 = vld [vmem:[#allocation2 + $0x28] sm:$0xff] (!%p2564_p6) }
 0x654   : > { %2918 = vmatprep.subr.bf16.mxu0 (!%p2564_p6), %v4146_v56  ;;  %2949 = vmatpush3.bf16.msra.mxu1 (!%p2564_p6), %v3255_v36  ;;  %v3258_v60 = vld [vmem:[%s3899_s12 + $0x18] sm:$0xff] (!%p2564_p6)   ;;  %v3259_v62 = vld [vmem:[%s3899_s12 + $0x20] sm:$0xff] (!%p2564_p6)   ;;  %v3260_v33 = vld [vmem:[%s3899_s12 + $0x28] sm:$0xff] (!%p2564_p6)   ;;  %v1597_v34 = vunpack.c.l.bf16 (!%p2564_p6), %v4160_v4  ;;  %v1598_v22 = vunpack.c.h.bf16 (!%p2564_p6), %v4160_v4  ;;  %v1601_v49 = vunpack.c.l.bf16 (!%p2564_p6), %v4170_v63  ;;  %v1602_v25 = vunpack.c.h.bf16 (!%p2564_p6), %v4170_v63 }
 0x655   : > { %2950 = vmatprep.subr.bf16.mxu1 (!%p2564_p6), %v3256_v32  ;;  %v4179_v15 = vld [vmem:[#allocation2 + $0x38] sm:$0xff] (!%p2564_p6)  ;;  %v3261_v0 = vld [vmem:[%s3899_s12 + $0x30] sm:$0xff] (!%p2564_p6)   ;;  %v1599_v24 = vunpack.c.l.bf16 (!%p2564_p6), %v4164_v61  ;;  %v1600_v52 = vunpack.c.h.bf16 (!%p2564_p6), %v4164_v61 }
 0x656   : > { %v4175_v13 = vld [vmem:[#allocation2 + $0x30] sm:$0xff] (!%p2564_p6)  ;;  %v3262_v1 = vld [vmem:[%s3899_s12 + $0x38] sm:$0xff] (!%p2564_p6)   ;;  %s1607_s12 = sld [smem:[#allocation6 + %s3558_s24]] (!%p2564_p6) }
 0x657   : > { %2919 = vmatpush3.bf16.msra.mxu0 (!%p2564_p6), %v4146_v56  ;;  %v4206_v2 = vld [vmem:[%s3905_s16 + $0x10] sm:$0xff] (!%p2564_p6)   ;;  %v4211_v3 = vld [vmem:[%s3905_s16 + $0x18] sm:$0xff] (!%p2564_p6)  }
 0x658   : > { %2920 = vmatprep.subr.bf16.mxu0 (!%p2564_p6), %v4152_v57  ;;  %2951 = vmatpush3.bf16.msra.mxu1 (!%p2564_p6), %v3256_v32 }
 0x659   : > { %2952 = vmatprep.subr.bf16.mxu1 %v3257_v59  ;;  %vm3582_vm1 = vmmov (!%p2583_p1), 0   ;;  %s4435_s15 = sld [smem:[#allocation39_spill]] (!%p2583_p1)  ;;  %s4436_s23 = sld [smem:[#allocation40_spill]] (!%p2583_p1) }
 0x65b   : > { %2921 = vmatpush3.bf16.msra.mxu0 %v4152_v57 }
 0x65c   : > { %2922 = vmatprep.subr.bf16.mxu0 %v4160_v4  ;;  %2953 = vmatpush3.bf16.msra.mxu1 %v3257_v59  ;;  %s1608_s17 = sadd.f32 1.0, %s1607_s12 }
 0x65d   : > { %2954 = vmatprep.subr.bf16.mxu1 %v3258_v60 }
 0x65f   : > { %2923 = vmatpush3.bf16.msra.mxu0 %v4160_v4 }
 0x660   : > { %2924 = vmatprep.subr.bf16.mxu0 %v4164_v61  ;;  %2955 = vmatpush3.bf16.msra.mxu1 %v3258_v60 }
 0x661   : > { %2956 = vmatprep.subr.bf16.mxu1 %v3259_v62 }
 0x663   : > { %2925 = vmatpush3.bf16.msra.mxu0 %v4164_v61 }
 0x664   : > { %2926 = vmatprep.subr.bf16.mxu0 %v4170_v63  ;;  %2957 = vmatpush3.bf16.msra.mxu1 %v3259_v62  ;;  %v1605_v62 = vunpack.c.l.bf16 %v4179_v15 }
 0x665   : > { %2958 = vmatprep.subr.bf16.mxu1 %v3260_v33 }
 0x667   : > { %2927 = vmatpush3.bf16.msra.mxu0 %v4170_v63  ;;  %v1606_v63 = vunpack.c.h.bf16 %v4179_v15 }
 0x668   : > { %2928 = vmatprep.subr.bf16.mxu0 %v4175_v13  ;;  %2959 = vmatpush3.bf16.msra.mxu1 %v3260_v33 }
 0x669   : > { %2960 = vmatprep.subr.bf16.mxu1 %v3261_v0 }
 0x66b   : > { %2929 = vmatpush3.bf16.msra.mxu0 %v4175_v13 }
 0x66c   : > { %2930 = vmatprep.subr.bf16.mxu0 %v4179_v15  ;;  %2961 = vmatpush3.bf16.msra.mxu1 %v3261_v0 }
 0x66d   : > { %2962 = vmatprep.subr.bf16.mxu1 %v3262_v1 }
 0x66f   : > { %2931 = vmatpush3.bf16.msra.mxu0 %v4179_v15 }
 0x670   : > { %2963 = vmatpush3.bf16.msra.mxu1 %v3262_v1  ;;  %v1603_v1 = vunpack.c.l.bf16 %v4175_v13 }
 0x672   : > { %2933 = vmatmul.mubr.bf16.vlgmr.msra.gmra.mrb[0].mxu0 %v595_v5  ;;  %v3263_v5 = vld [vmem:[%s3905_s16] sm:$0xff]  }
 0x673   : > { %2936 = vmatprep.mubr.bf16.mxu0 %v596_v6  ;;  %v4202_v6 = vld [vmem:[%s3905_s16 + $0x8] sm:$0xff]   ;;  %2980 = vmatprep.subr.bf16.mxu0 %v3263_v5 }
 0x674   : > { %3088 = vmatprep.subr.bf16.mxu1 %v3263_v5  ;;  %2981 = vmatpush3.bf16.msra.mxu0 %v3263_v5 }
 0x675   : > { %2982 = vmatprep.subr.bf16.mxu0 %v4202_v6 }
 0x678   : > { %2983 = vmatpush3.bf16.msra.mxu0 %v4202_v6 }
 0x679   : > { %2984 = vmatprep.subr.bf16.mxu0 %v4206_v2 }
 0x67a   : > { %2937 = vmatmul.mubr.bf16.gmra.mrb[4].mxu0 %v597_v7  ;;  %v4216_v7 = vld [vmem:[%s3905_s16 + $0x20] sm:$0xff]  }
 0x67b   : > { %2940 = vmatprep.mubr.bf16.mxu0 %v598_v8  ;;  %v4221_v8 = vld [vmem:[%s3905_s16 + $0x28] sm:$0xff]  }
 0x67c   : > { %2985 = vmatpush3.bf16.msra.mxu0 %v4206_v2 }
 0x67d   : > { %2986 = vmatprep.subr.bf16.mxu0 %v4211_v3 }
 0x680   : > { %2987 = vmatpush3.bf16.msra.mxu0 %v4211_v3 }
 0x681   : > { %2988 = vmatprep.subr.bf16.mxu0 %v4216_v7 }
 0x682   : > { %2941 = vmatmul.mubr.bf16.gmra.mrb[8].mxu0 %v599_v9  ;;  %v1593_v9 = vunpack.c.l.bf16 %v4146_v56 }
 0x683   : > { %2944 = vmatprep.mubr.bf16.mxu0 %v600_v10  ;;  %v1594_v10 = vunpack.c.h.bf16 %v4146_v56 }
 0x684   : > { %2989 = vmatpush3.bf16.msra.mxu0 %v4216_v7 }
 0x685   : > { %2990 = vmatprep.subr.bf16.mxu0 %v4221_v8 }
 0x688   : > { %2991 = vmatpush3.bf16.msra.mxu0 %v4221_v8 }
 0x68a   : > { %2945 = vmatmul.mubr.bf16.gmra.mrb[12].mxu0 %v601_v11  ;;  %v4229_v11 = vstv %s1608_s17 }
 0x68b   : > { %v1612_v17 = vmul.f32 %v4229_v11, %v1593_v9  ;;  %v1613_v18 = vmul.f32 %v4229_v11, %v1594_v10  ;;  %v1610_v19 = vmul.f32 %v4229_v11, %v1591_v14  ;;  %v1611_v21 = vmul.f32 %v4229_v11, %v1592_v16 }
 0x68c   : > { %v1616_v40 = vmul.f32 %v4229_v11, %v1597_v34  ;;  %v1617_v41 = vmul.f32 %v4229_v11, %v1598_v22  ;;  %v1614_v43 = vmul.f32 %v4229_v11, %v1595_v38  ;;  %v1615_v44 = vmul.f32 %v4229_v11, %v1596_v20 }
 0x68d   : > { %v1620_v54 = vmul.f32 %v4229_v11, %v1601_v49  ;;  %v1621_v55 = vmul.f32 %v4229_v11, %v1602_v25  ;;  %v1618_v57 = vmul.f32 %v4229_v11, %v1599_v24  ;;  %v1619_v36 = vmul.f32 %v4229_v11, %v1600_v52 }
 0x68e   : > { %v1625_v10 = vmul.f32 %v4229_v11, %v1606_v63  ;;  %v1622_v15 = vmul.f32 %v4229_v11, %v1603_v1 }
 0x745   : > { %v2934_v12 = vpop.f32.mrb[0].mxu0 }
 0x746   : > { %v1516_v23 = vpop.f32.mrb[1].mxu0  ;;  %v1628_v26 = vadd.f32 %v2934_v12, %v1612_v17 }
 0x747   : > { %v2935_v58 = vpop.f32.mrb[2].mxu0  ;;  %v1626_v35 = vadd.f32 %v1610_v19, %v1516_v23 }
 0x748   : > { %v1629_v27 = vadd.f32 %v2935_v58, %v1613_v18  ;;  %v1519_v28 = vpop.f32.mrb[3].mxu0 }
 0x749   : > { %v1627_v37 = vadd.f32 %v1611_v21, %v1519_v28 }
 0x74a   : > { %v1643_v39 = vpack.c.bf16 %v1629_v27, %v1628_v26  ;;  %v2565_v26 = vld [vmem:[%s3917_s4] ss:$0 sm:$0xff]  ;;  %s4434_s4 = sld [smem:[#allocation35_spill]] (!%p2583_p1) }
 0x74b   : > { %v1642_v29 = vpack.c.bf16 %v1627_v37, %v1626_v35 }
 0x74d   : > { %v2938_v42 = vpop.f32.mrb[4].mxu0  ;;  %2964 = vmatprep.mubr.bf16.mxu1 %v1642_v29 }
 0x74e   : > { %v1532_v45 = vpop.f32.mrb[5].mxu0  ;;  %2965 = vmatmul.mubr.bf16.vlgmr.msra.gmra.mrb[0].mxu1 %v1643_v39  ;;  %v1632_v47 = vadd.f32 %v2938_v42, %v1616_v40 }
 0x74f   : > { %v2939_v46 = vpop.f32.mrb[6].mxu0  ;;  %3096 = vmatpush3.bf16.msra.mxu1 %v3263_v5  ;;  %v1630_v50 = vadd.f32 %v1614_v43, %v1532_v45  ;;  %v1604_v5 = vunpack.c.h.bf16 %v4175_v13 }
 0x750   : > { %v1633_v30 = vadd.f32 %v2939_v46, %v1617_v41  ;;  %v1535_v48 = vpop.f32.mrb[7].mxu0  ;;  %3089 = vmatprep.subr.bf16.mxu1 %v4202_v6 }
 0x751   : > { %v1631_v51 = vadd.f32 %v1615_v44, %v1535_v48  ;;  %v1623_v16 = vmul.f32 %v4229_v11, %v1604_v5 }
 0x752   : > { %v1645_v31 = vpack.c.bf16 %v1633_v30, %v1632_v47 }
 0x753   : > { %v1644_v53 = vpack.c.bf16 %v1631_v51, %v1630_v50  ;;  %3097 = vmatpush3.bf16.msra.mxu1 %v4202_v6 }
 0x754   : > { %3090 = vmatprep.subr.bf16.mxu1 %v4206_v2 }
 0x755   : > { %v2942_v56 = vpop.f32.mrb[8].mxu0  ;;  %2968 = vmatprep.mubr.bf16.mxu1 %v1644_v53 }
 0x756   : > { %v1548_v32 = vpop.f32.mrb[9].mxu0  ;;  %2969 = vmatmul.mubr.bf16.gmra.mrb[4].mxu1 %v1645_v31  ;;  %v1636_v4 = vadd.f32 %v2942_v56, %v1620_v54 }
 0x757   : > { %v2943_v59 = vpop.f32.mrb[10].mxu0  ;;  %3098 = vmatpush3.bf16.msra.mxu1 %v4206_v2  ;;  %v1634_v33 = vadd.f32 %v1618_v57, %v1548_v32  ;;  %v1624_v2 = vmul.f32 %v4229_v11, %v1605_v62  ;;  %v3269_v11 = vld [vmem:[%s3905_s16 + $0x30] sm:$0xff]  }
 0x758   : > { %v1637_v60 = vadd.f32 %v2943_v59, %v1621_v55  ;;  %v1551_v61 = vpop.f32.mrb[11].mxu0  ;;  %3091 = vmatprep.subr.bf16.mxu1 %v4211_v3  ;;  %2992 = vmatprep.subr.bf16.mxu0 %v3269_v11 }
 0x759   : > { %v1635_v0 = vadd.f32 %v1619_v36, %v1551_v61  ;;  %2993 = vmatpush3.bf16.msra.mxu0 %v3269_v11 }
 0x75a   : > { %v1647_v6 = vpack.c.bf16 %v1637_v60, %v1636_v4 }
 0x75b   : > { %v1646_v9 = vpack.c.bf16 %v1635_v0, %v1634_v33  ;;  %3099 = vmatpush3.bf16.msra.mxu1 %v4211_v3 }
 0x75c   : > { %3092 = vmatprep.subr.bf16.mxu1 %v4216_v7 }
 0x75d   : > { %v2946_v14 = vpop.f32.mrb[12].mxu0  ;;  %2972 = vmatprep.mubr.bf16.mxu1 %v1646_v9 }
 0x75e   : > { %v1564_v17 = vpop.f32.mrb[13].mxu0  ;;  %2973 = vmatmul.mubr.bf16.gmra.mrb[8].mxu1 %v1647_v6  ;;  %v1640_v18 = vadd.f32 %v2946_v14, %v1624_v2 }
 0x75f   : > { %v2947_v13 = vpop.f32.mrb[14].mxu0  ;;  %3100 = vmatpush3.bf16.msra.mxu1 %v4216_v7  ;;  %v1638_v19 = vadd.f32 %v1622_v15, %v1564_v17  ;;  %v3270_v7 = vld [vmem:[%s3905_s16 + $0x38] sm:$0xff]  }
 0x760   : > { %v1641_v3 = vadd.f32 %v2947_v13, %v1625_v10  ;;  %v1567_v12 = vpop.f32.mrb[15].mxu0  ;;  %3093 = vmatprep.subr.bf16.mxu1 %v4221_v8  ;;  %2994 = vmatprep.subr.bf16.mxu0 %v3270_v7 }
 0x761   : > { %v1639_v21 = vadd.f32 %v1623_v16, %v1567_v12  ;;  %2995 = vmatpush3.bf16.msra.mxu0 %v3270_v7  ;;  %v2574_v12 = vld [vmem:[%s3922_s13] ss:$0 sm:$0xff] }
 0x762   : > { %v1649_v23 = vpack.c.bf16 %v1641_v3, %v1640_v18 }
 0x763   : > { %v1648_v58 = vpack.c.bf16 %v1639_v21, %v1638_v19  ;;  %3101 = vmatpush3.bf16.msra.mxu1 %v4221_v8 }
 0x764   : > { %3094 = vmatprep.subr.bf16.mxu1 %v3269_v11 }
 0x765   : > { %2976 = vmatprep.mubr.bf16.mxu1 %v1648_v58 }
 0x766   : > { %2977 = vmatmul.mubr.bf16.gmra.mrb[12].mxu1 %v1649_v23 }
 0x767   : > { %3102 = vmatpush3.bf16.msra.mxu1 %v3269_v11 }
 0x768   : > { %3095 = vmatprep.subr.bf16.mxu1 %v3270_v7 }
 0x76b   : > { %3103 = vmatpush3.bf16.msra.mxu1 %v3270_v7 }
 0x821   : > { %v2966_v27 = vpop.f32.mrb[0].mxu1 }
 0x822   : > { %v1764_v28 = vadd.f32 %v2966_v27, %v2565_v26  ;;  %v1755_v34 = vpop.f32.mrb[1].mxu1 }
 0x823   : > { %v1756_v22 = vadd.f32 %v2565_v26, %v1755_v34  ;;  %v2967_v35 = vpop.f32.mrb[2].mxu1 }
 0x824   : > { %v1767_v37 = vadd.f32 %v2967_v35, %v2565_v26  ;;  %v1758_v8 = vpop.f32.mrb[3].mxu1  ;;  %v1820_v20 = vmax.f32 %v1764_v28, 0.0 }
 0x825   : > { %v1759_v38 = vadd.f32 %v2565_v26, %v1758_v8  ;;  %v1818_v29 = vmax.f32 %v1756_v22, 0.0 }
 0x826   : > { %v1821_v39 = vmax.f32 %v1767_v37, 0.0 }
 0x827   : > { %v1819_v40 = vmax.f32 %v1759_v38, 0.0 }
 0x828   : > { %v1835_v41 = vpack.c.bf16 %v1821_v39, %v1820_v20 }
 0x829   : > { %v1834_v42 = vpack.c.bf16 %v1819_v40, %v1818_v29  ;;  %v2970_v43 = vpop.f32.mrb[4].mxu1 }
 0x82a   : > { %v1780_v44 = vadd.f32 %v2970_v43, %v2565_v26  ;;  %v1771_v45 = vpop.f32.mrb[5].mxu1 }
 0x82b   : > { %v1772_v46 = vadd.f32 %v2565_v26, %v1771_v45  ;;  %v2971_v47 = vpop.f32.mrb[6].mxu1  ;;  %2996 = vmatprep.mubr.bf16.mxu0 %v1834_v42 }
 0x82c   : > { %v1783_v30 = vadd.f32 %v2971_v47, %v2565_v26  ;;  %v1774_v48 = vpop.f32.mrb[7].mxu1  ;;  %2997 = vmatmul.mubr.bf16.vlgmr.msra.gmra.mrb[16].mxu0 %v1835_v41  ;;  %v1824_v25 = vmax.f32 %v1780_v44, 0.0 }
 0x82d   : > { %v1775_v49 = vadd.f32 %v2565_v26, %v1774_v48  ;;  %v1822_v51 = vmax.f32 %v1772_v46, 0.0 }
 0x82e   : > { %v1825_v50 = vmax.f32 %v1783_v30, 0.0 }
 0x82f   : > { %v1823_v24 = vmax.f32 %v1775_v49, 0.0 }
 0x830   : > { %v1837_v52 = vpack.c.bf16 %v1825_v50, %v1824_v25 }
 0x831   : > { %v1836_v31 = vpack.c.bf16 %v1823_v24, %v1822_v51  ;;  %v2974_v53 = vpop.f32.mrb[8].mxu1 }
 0x832   : > { %v1796_v54 = vadd.f32 %v2974_v53, %v2565_v26  ;;  %v1787_v55 = vpop.f32.mrb[9].mxu1 }
 0x833   : > { %v1788_v56 = vadd.f32 %v2565_v26, %v1787_v55  ;;  %v2975_v57 = vpop.f32.mrb[10].mxu1  ;;  %3000 = vmatprep.mubr.bf16.mxu0 %v1836_v31 }
 0x834   : > { %v1799_v36 = vadd.f32 %v2975_v57, %v2565_v26  ;;  %v1790_v32 = vpop.f32.mrb[11].mxu1  ;;  %3001 = vmatmul.mubr.bf16.gmra.mrb[20].mxu0 %v1837_v52  ;;  %v1828_v4 = vmax.f32 %v1796_v54, 0.0 }
 0x835   : > { %v1791_v59 = vadd.f32 %v2565_v26, %v1790_v32  ;;  %v1826_v61 = vmax.f32 %v1788_v56, 0.0 }
 0x836   : > { %v1829_v60 = vmax.f32 %v1799_v36, 0.0 }
 0x837   : > { %v1827_v62 = vmax.f32 %v1791_v59, 0.0 }
 0x838   : > { %v1839_v63 = vpack.c.bf16 %v1829_v60, %v1828_v4 }
 0x839   : > { %v1838_v33 = vpack.c.bf16 %v1827_v62, %v1826_v61  ;;  %v2978_v0 = vpop.f32.mrb[12].mxu1 }
 0x83a   : > { %v1812_v1 = vadd.f32 %v2978_v0, %v2565_v26  ;;  %v1803_v5 = vpop.f32.mrb[13].mxu1 }
 0x83b   : > { %v1804_v6 = vadd.f32 %v2565_v26, %v1803_v5  ;;  %v2979_v9 = vpop.f32.mrb[14].mxu1  ;;  %3004 = vmatprep.mubr.bf16.mxu1 %v1838_v33 }
 0x83c   : > { %v1815_v2 = vadd.f32 %v2979_v9, %v2565_v26  ;;  %v1806_v10 = vpop.f32.mrb[15].mxu1  ;;  %3005 = vmatmul.mubr.bf16.vlgmr.msra.gmra.mrb[16].mxu1 %v1839_v63  ;;  %v1832_v15 = vmax.f32 %v1812_v1, 0.0 }
 0x83d   : > { %v1807_v14 = vadd.f32 %v2565_v26, %v1806_v10  ;;  %v1830_v17 = vmax.f32 %v1804_v6, 0.0 }
 0x83e   : > { %v1833_v16 = vmax.f32 %v1815_v2, 0.0 }
 0x83f   : > { %v1831_v13 = vmax.f32 %v1807_v14, 0.0  ;;  %v3581_v14 = vmov (!%p2583_p1), 0.0  }
 0x840   : > { %v1841_v18 = vpack.c.bf16 %v1833_v16, %v1832_v15  ;;  %3012 = vmatprep.subr.bf16.mxu0 (!%p2583_p1), %v3581_v14  ;;  %3028 = vmatprep.mubr.msk.bf16.mxu0 (!%p2583_p1), %vm3582_vm1, %v3581_v14  ;;  %v3271_v15 = vld [vmem:[#allocation14] sm:$0xff] (!%p2583_p1)   ;;  %v3272_v16 = vld [vmem:[#allocation14 + $0x8] sm:$0xff] (!%p2583_p1)  }
 0x841   : > { %v1840_v3 = vpack.c.bf16 %v1831_v13, %v1830_v17  ;;  %3032 = vmatprep.subr.bf16.mxu1 (!%p2583_p1), %v3581_v14  ;;  %v3273_v17 = vld [vmem:[#allocation14 + $0x10] sm:$0xff] (!%p2583_p1)   ;;  %v3274_v13 = vld [vmem:[#allocation14 + $0x18] sm:$0xff] (!%p2583_p1)  }
 0x842   : > { %3033 = vmatpush3.bf16.msra.mxu1 (!%p2583_p1), %v3271_v15 }
 0x843   : > { %3008 = vmatprep.mubr.bf16.mxu1 %v1840_v3  ;;  %3034 = vmatprep.subr.bf16.mxu1 (!%p2583_p1), %v3581_v14  ;;  %v2053_v3 = vld [vmem:[%s4434_s4] sm:$0xf] (!%p2583_p1) }
 0x844   : > { %3009 = vmatmul.mubr.bf16.gmra.mrb[20].mxu1 %v1841_v18  ;;  %v3275_v18 = vld [vmem:[#allocation14 + $0x20] sm:$0xff] (!%p2583_p1)  }
 0x845   : > { %3048 = vmatprep.mubr.msk.bf16.mxu1 (!%p2583_p1), %vm3582_vm1, %v3581_v14 }
 0x846   : > { %3035 = vmatpush3.bf16.msra.mxu1 (!%p2583_p1), %v3272_v16 }
 0x847   : > { %3036 = vmatprep.subr.bf16.mxu1 (!%p2583_p1), %v3581_v14 }
 0x84a   : > { %3037 = vmatpush3.bf16.msra.mxu1 (!%p2583_p1), %v3273_v17 }
 0x84b   : > { %3038 = vmatprep.subr.bf16.mxu1 (!%p2583_p1), %v3581_v14 }
 0x84e   : > { %3039 = vmatpush3.bf16.msra.mxu1 (!%p2583_p1), %v3274_v13 }
 0x84f   : > { %3040 = vmatprep.subr.bf16.mxu1 (!%p2583_p1), %v3581_v14 }
 0x852   : > { %3041 = vmatpush3.bf16.msra.mxu1 (!%p2583_p1), %v3275_v18 }
 0x853   : > { %3042 = vmatprep.subr.bf16.mxu1 (!%p2583_p1), %v3581_v14 }
 0x8ff   : > { %v2998_v19 = vpop.f32.mrb[16].mxu0 }
 0x900   : > { %v1956_v21 = vadd.f32 %v2998_v19, %v2574_v12  ;;  %v1947_v23 = vpop.f32.mrb[17].mxu0  ;;  %v3277_v19 = vld [vmem:[#allocation14 + $0x30] sm:$0xff] (!%p2583_p1)  }
 0x901   : > { %v1948_v58 = vadd.f32 %v2574_v12, %v1947_v23  ;;  %v2999_v11 = vpop.f32.mrb[18].mxu0  ;;  %v3279_v23 = vld [vmem:[#allocation16] sm:$0xff] (!%p2583_p1)  }
 0x902   : > { %v1959_v7 = vadd.f32 %v2999_v11, %v2574_v12  ;;  %v1950_v27 = vpop.f32.mrb[19].mxu0  ;;  %v2012_v34 = vmax.f32 %v1956_v21, 0.0  ;;  %v3278_v21 = vld [vmem:[#allocation14 + $0x38] sm:$0xff] (!%p2583_p1)   ;;  %v3281_v11 = vld [vmem:[#allocation16 + $0x10] sm:$0xff] (!%p2583_p1)  }
 0x903   : > { %v1951_v28 = vadd.f32 %v2574_v12, %v1950_v27  ;;  %v2010_v26 = vmax.f32 %v1948_v58, 0.0  ;;  %v3280_v58 = vld [vmem:[#allocation16 + $0x8] sm:$0xff] (!%p2583_p1)   ;;  %v3283_v27 = vld [vmem:[#allocation16 + $0x20] sm:$0xff] (!%p2583_p1)  }
 0x904   : > { %v2013_v22 = vmax.f32 %v1959_v7, 0.0  ;;  %v3282_v7 = vld [vmem:[#allocation16 + $0x18] sm:$0xff] (!%p2583_p1)  }
 0x905   : > { %v2011_v35 = vmax.f32 %v1951_v28, 0.0  ;;  %v3284_v28 = vld [vmem:[#allocation16 + $0x28] sm:$0xff] (!%p2583_p1)  }
 0x906   : > { %v4275_v37 = vpack.c.bf16 %v2013_v22, %v2012_v34 }
 0x907   : > { %v2026_v8 = vpack.c.bf16 %v2011_v35, %v2010_v26  ;;  %v3002_v38 = vpop.f32.mrb[20].mxu0 }
 0x908   : > { %2037 = vst [vmem:[#allocation3 + $0x8] sm:$0xff] %v4275_v37  ;;  %v1972_v20 = vadd.f32 %v3002_v38, %v2574_v12  ;;  %v1963_v39 = vpop.f32.mrb[21].mxu0  ;;  %v3286_v38 = vld [vmem:[#allocation16 + $0x38] sm:$0xff] (!%p2583_p1)  }
 0x909   : > { %2036 = vst [vmem:[#allocation3] sm:$0xff] %v2026_v8  ;;  %v1964_v29 = vadd.f32 %v2574_v12, %v1963_v39  ;;  %v3003_v40 = vpop.f32.mrb[22].mxu0  ;;  %3013 = vmatpush3.bf16.msra.mxu0 (!%p2583_p1), %v2026_v8  ;;  %v3285_v8 = vld [vmem:[#allocation16 + $0x30] sm:$0xff] (!%p2583_p1)  }
 0x90a   : > { %v1975_v41 = vadd.f32 %v3003_v40, %v2574_v12  ;;  %v1966_v42 = vpop.f32.mrb[23].mxu0  ;;  %v2016_v44 = vmax.f32 %v1972_v20, 0.0  ;;  %3014 = vmatprep.subr.bf16.mxu0 (!%p2583_p1), %v3581_v14  ;;  %v2584_v20 = vld [vmem:[%s4435_s15] ss:$0 sm:$0xff] (!%p2583_p1) }
 0x90b   : > { %v1967_v43 = vadd.f32 %v2574_v12, %v1966_v42  ;;  %v2014_v46 = vmax.f32 %v1964_v29, 0.0 }
 0x90c   : > { %v2017_v45 = vmax.f32 %v1975_v41, 0.0 }
 0x90d   : > { %v2015_v47 = vmax.f32 %v1967_v43, 0.0  ;;  %3015 = vmatpush3.bf16.msra.mxu0 (!%p2583_p1), %v4275_v37 }
 0x90e   : > { %v2029_v30 = vpack.c.bf16 %v2017_v45, %v2016_v44  ;;  %3016 = vmatprep.subr.bf16.mxu0 (!%p2583_p1), %v3581_v14  ;;  %v2593_v45 = vld [vmem:[%s4436_s23] ss:$0 sm:$0xff] (!%p2583_p1) }
 0x90f   : > { %v2028_v48 = vpack.c.bf16 %v2015_v47, %v2014_v46  ;;  %v3006_v49 = vpop.f32.mrb[16].mxu1 }
 0x910   : > { %2039 = vst [vmem:[#allocation3 + $0x18] sm:$0xff] %v2029_v30  ;;  %v1988_v25 = vadd.f32 %v3006_v49, %v2574_v12  ;;  %v1979_v50 = vpop.f32.mrb[17].mxu1 }
 0x911   : > { %2038 = vst [vmem:[#allocation3 + $0x10] sm:$0xff] %v2028_v48  ;;  %v1980_v51 = vadd.f32 %v2574_v12, %v1979_v50  ;;  %v3007_v24 = vpop.f32.mrb[18].mxu1  ;;  %3017 = vmatpush3.bf16.msra.mxu0 (!%p2583_p1), %v2028_v48 }
 0x912   : > { %v1991_v52 = vadd.f32 %v3007_v24, %v2574_v12  ;;  %v1982_v31 = vpop.f32.mrb[19].mxu1  ;;  %v2020_v54 = vmax.f32 %v1988_v25, 0.0  ;;  %3018 = vmatprep.subr.bf16.mxu0 (!%p2583_p1), %v3581_v14 }
 0x913   : > { %v1983_v53 = vadd.f32 %v2574_v12, %v1982_v31  ;;  %v2018_v56 = vmax.f32 %v1980_v51, 0.0 }
 0x914   : > { %v2021_v55 = vmax.f32 %v1991_v52, 0.0 }
 0x915   : > { %v2019_v57 = vmax.f32 %v1983_v53, 0.0  ;;  %3019 = vmatpush3.bf16.msra.mxu0 (!%p2583_p1), %v2029_v30 }
 0x916   : > { %v2031_v36 = vpack.c.bf16 %v2021_v55, %v2020_v54  ;;  %3020 = vmatprep.subr.bf16.mxu0 (!%p2583_p1), %v3581_v14 }
 0x917   : > { %v2030_v32 = vpack.c.bf16 %v2019_v57, %v2018_v56  ;;  %v3010_v59 = vpop.f32.mrb[20].mxu1 }
 0x918   : > { %2041 = vst [vmem:[#allocation3 + $0x28] sm:$0xff] %v2031_v36  ;;  %v2004_v4 = vadd.f32 %v3010_v59, %v2574_v12  ;;  %v1995_v60 = vpop.f32.mrb[21].mxu1 }
 0x919   : > { %2040 = vst [vmem:[#allocation3 + $0x20] sm:$0xff] %v2030_v32  ;;  %v1996_v61 = vadd.f32 %v2574_v12, %v1995_v60  ;;  %v3011_v62 = vpop.f32.mrb[22].mxu1  ;;  %3021 = vmatpush3.bf16.msra.mxu0 (!%p2583_p1), %v2030_v32 }
 0x91a   : > { %v2007_v63 = vadd.f32 %v3011_v62, %v2574_v12  ;;  %v1998_v33 = vpop.f32.mrb[23].mxu1  ;;  %v2024_v1 = vmax.f32 %v2004_v4, 0.0  ;;  %3022 = vmatprep.subr.bf16.mxu0 (!%p2583_p1), %v3581_v14 }
 0x91b   : > { %v1999_v0 = vadd.f32 %v2574_v12, %v1998_v33  ;;  %v2022_v6 = vmax.f32 %v1996_v61, 0.0  ;;  %2047 = sbr.rel (%p2583_p1) target bundleno = 2991 (0xbaf), region = 120  ;;  %v3276_v12 = vld [vmem:[#allocation14 + $0x28] sm:$0xff] (!%p2583_p1)  }
 0x91c   : > { %v2025_v5 = vmax.f32 %v2007_v63, 0.0  ;;  %3043 = vmatpush3.bf16.msra.mxu1 (!%p2583_p1), %v3276_v12 }
 0x91d   : > { %v2023_v9 = vmax.f32 %v1999_v0, 0.0  ;;  %3023 = vmatpush3.bf16.msra.mxu0 (!%p2583_p1), %v2031_v36  ;;  %3044 = vmatprep.subr.bf16.mxu1 (!%p2583_p1), %v3581_v14 }
 0x91e   : > { %v2033_v2 = vpack.c.bf16 %v2025_v5, %v2024_v1  ;;  %3024 = vmatprep.subr.bf16.mxu0 (!%p2583_p1), %v3581_v14 }
 0x91f   : > { %v2032_v10 = vpack.c.bf16 %v2023_v9, %v2022_v6 }
 0x920   : > { %2043 = vst [vmem:[#allocation3 + $0x38] sm:$0xff] %v2033_v2  ;;  %3045 = vmatpush3.bf16.msra.mxu1 (!%p2583_p1), %v3277_v19 }
 0x921   : > { %2042 = vst [vmem:[#allocation3 + $0x30] sm:$0xff] %v2032_v10  ;;  %3025 = vmatpush3.bf16.msra.mxu0 (!%p2583_p1), %v2032_v10  ;;  %3046 = vmatprep.subr.bf16.mxu1 (!%p2583_p1), %v3581_v14 }
 0x922   : > { %3026 = vmatprep.subr.bf16.mxu0 %v3581_v14 }
 0x924   : > { %3047 = vmatpush3.bf16.msra.mxu1 %v3278_v21 }
 0x925   : > { %3027 = vmatpush3.bf16.msra.mxu0 %v2033_v2 }
 0x926   : > { %3052 = vmatprep.subr.bf16.mxu0 %v3581_v14 }
 0x928   : > { %3029 = vmatmul.mubr.bf16.vlgmr.msra.gmra.mrb[0].mxu0 %v2053_v3 }
 0x929   : > { %3068 = vmatprep.mubr.msk.bf16.mxu0 %vm3582_vm1, %v3581_v14  ;;  %3053 = vmatpush3.bf16.msra.mxu0 %v3279_v23 }
 0x92a   : > { %3054 = vmatprep.subr.bf16.mxu0 %v3581_v14 }
 0x92d   : > { %3055 = vmatpush3.bf16.msra.mxu0 %v3280_v58 }
 0x92e   : > { %3056 = vmatprep.subr.bf16.mxu0 %v3581_v14 }
 0x931   : > { %3057 = vmatpush3.bf16.msra.mxu0 %v3281_v11 }
 0x932   : > { %3058 = vmatprep.subr.bf16.mxu0 %v3581_v14 }
 0x935   : > { %3059 = vmatpush3.bf16.msra.mxu0 %v3282_v7 }
 0x936   : > { %3060 = vmatprep.subr.bf16.mxu0 %v3581_v14 }
 0x939   : > { %3061 = vmatpush3.bf16.msra.mxu0 %v3283_v27 }
 0x93a   : > { %3062 = vmatprep.subr.bf16.mxu0 %v3581_v14 }
 0x93d   : > { %3063 = vmatpush3.bf16.msra.mxu0 %v3284_v28 }
 0x93e   : > { %3064 = vmatprep.subr.bf16.mxu0 %v3581_v14 }
 0x941   : > { %3065 = vmatpush3.bf16.msra.mxu0 %v3285_v8 }
 0x942   : > { %3066 = vmatprep.subr.bf16.mxu0 %v3581_v14 }
 0x945   : > { %3067 = vmatpush3.bf16.msra.mxu0 %v3286_v38 }
 0x9fb   : > { %v2088_v34 = vpop.f32.mrb[0].mxu0 }
 0x9fc   : > { %v3030_v22 = vpop.f32.mrb[1].mxu0  ;;  %v2100_v37 = vpack.c.bf16 %v2088_v34, %v2088_v34 }
 0x9fd   : > { %v2091_v26 = vpop.f32.mrb[2].mxu0 }
 0x9fe   : > { %v3031_v35 = vpop.f32.mrb[3].mxu0  ;;  %3049 = vmatmul.mubr.bf16.vlgmr.msra.gmra.mrb[0].mxu1 %v2100_v37 }
 0xad1   : > { %v2206_v39 = vpop.f32.mrb[0].mxu1 }
 0xad2   : > { %v2207_v29 = vadd.f32 %v2584_v20, %v2206_v39  ;;  %v3050_v40 = vpop.f32.mrb[1].mxu1 }
 0xad3   : > { %v2209_v41 = vpop.f32.mrb[2].mxu1 }
 0xad4   : > { %v2212_v42 = vmax.f32 %v2207_v29, 0.0  ;;  %v3051_v43 = vpop.f32.mrb[3].mxu1 }
 0xad6   : > { %v2213_v44 = vpack.c.bf16 %v2212_v42, %v2212_v42 }
 0xad8   : > { %3069 = vmatmul.mubr.bf16.vlgmr.msra.gmra.mrb[4].mxu0 %v2213_v44 }
 0xbab   : > { %v2319_v46 = vpop.f32.mrb[4].mxu0 }
 0xbac   : > { %v2320_v47 = vadd.f32 %v2593_v45, %v2319_v46  ;;  %v3070_v30 = vpop.f32.mrb[5].mxu0 }
 0xbad   : > { %v2322_v48 = vpop.f32.mrb[6].mxu0 }
 0xbae   : > { %2325 = vst [vmem:[#allocation17] sm:$0xff] %v2320_v47  ;;  %v3071_v49 = vpop.f32.mrb[7].mxu0 }
 0xbaf PF: > { %p3159_p2 = scmp.eq.s32.totalorder %s3678_s27, 2  ;;  %s3583_s28 = smov [#allocation17]  }
 0xbb0   : > { %s2333_s1 = sshll.u32 %s3583_s28, 4  ;;  %s2334_s1 = int_to_ptr.vmem [resolvable:$true] %s2333_s1 }
 0xbb1   : > { %s3470_s11 = scalar_lea.vmem %s2334_s1, 128  ;;  %p3477_p5 = scmp.lt.s32.totalorder %s2334_s1, %s2334_s1 }
 0xbb2   : > { %p3471_p4 = scmp.ne.s32.totalorder %s2334_s1, %s3470_s11  ;;  %p3478_p12 = scmp.lt.s32.totalorder %s3470_s11, %s3470_s11 }
 0xbb4   : > { %p3472_p7 = pnand %p3471_p4, %p3159_p2  ;;  %p3479_p11 = por %p3478_p12, %p3477_p5 }
 0xbb6   : > { %p3473_p3 = pneg %p3472_p7 }
 0xbb8   : > { %p3480_p8 = pnand %p3479_p11, %p3473_p3 }
 0xbba   : > { %3483 = shalt.err (!%p3480_p8)
}
 0xbbb   : > { %s4437_s21 = sld [smem:[#allocation41_spill]] }
 0xbc1   : > { %s4438_s14 = smov %s4437_s21  ;;  %s3484_s18 = scalar_lea.hbm %s4437_s21, 128 }
 0xbc2   : > { %p3485_p10 = scmp.ne.s32.totalorder %s4438_s14, %s3484_s18  ;;  %p3490_p13 = scmp.lt.u32.totalorder %s3484_s18, %s4438_s14 }
 0xbc4   : > { %p3486_p0 = pnand %p3485_p10, %p3159_p2 }
 0xbc6   : > { %p3487_p9 = pneg %p3486_p0 }
 0xbc8   : > { %p3492_p6 = pnand %p3490_p13, %p3487_p9 }
 0xbca   : > { %3495 = shalt.err (!%p3492_p6)
}
 0xbcb   : > { %3127 = dma.vmem_to_hbm [thread:$0]  (%p3159_p2), %s2334_s1, 128, %s4438_s14, [#allocation8]  }
 0xbcc   : > { %3541 = dma.done.wait (%p3159_p2), [#allocation8], 128  }
 0xbcd   : > { %3543 = vsyncadd (%p3159_p2), [#allocation8], 4294967168 }
 0xbce PF: > { %s4439_s17 = sld [smem:[#allocation30_spill]]  ;;  %s4440_s24 = sld [smem:[#allocation28_spill]] }
 0xbcf   : > { %s4441_s23 = sld [smem:[#allocation32_spill]]  ;;  %s4442_s16 = sld [smem:[#allocation29_spill]] }
 0xbd0   : > { %s4443_s25 = sld [smem:[#allocation31_spill]]  ;;  %s4444_s21 = smov %s3550_s22 }
 0xbd4   : > { %s29_s26 = sadd.s32 1, %s4439_s17   ;;  %s4445_s22 = smov %s4440_s24 }
 0xbd5   : > { %p26_p1 = scmp.ge.s32.totalorder %s29_s26, 5   ;;  %s4446_s24 = smov %s4442_s16 }
 0xbd7   :  { %28 = sbr.rel (!%p26_p1) target bundleno = 18 (0x12), region = 184 }
 0xbde   :  { %2346 = vsyncpa [#allocation7], 1 }
 0xbdf   :  { %2348 = vsyncpa [#allocation7 + $0x1], 1 }
 0xbe0   :  { %2349 = vsyncpa [#allocation12], 1 }
 0xbe1   :  { %2351 = vsyncpa [#allocation12 + $0x1], 1 }
 0xbe2   :  { %2352 = vsyncpa [#allocation15], 1 }
 0xbe3   :  { %2353 = vsyncpa [#allocation8], 1 }
 0xbe4   :  { %2355 = vsyncpa [#allocation8 + $0x1], 1 }
 0xbe5   :  { %2356 = vsyncpa [#allocation9], 1 }
 0xbe6   :  { %2358 = vsyncpa [#allocation9 + $0x1], 1 }
 0xbe7   :  { %2359 = vsyncmov [#allocation5] }
 0xbea   :  { %s2360_s27 = vpop.sfrf %2359 }
 0xbeb   :  { %p2606_p2 = scmp.ne.s32.totalorder %s2360_s27, 0 }
 0xbed   :  { %2364 = shalt.err (%p2606_p2)  }

</bundles_post_ra>
